<compile_context>
chip_gen: v5e
topology: v5e:2x2
jax: 0.10.0
libtpu: 0.0.40
codegen_flags: <defaults>
</compile_context>

<pallas_src>
import functools

import jax
import jax.numpy as jnp
from jax.experimental import pallas as pl
from jax.experimental.pallas import tpu as pltpu

# -------------------- small synthetic CLIP-text config (lane-dense) --------------------
VOCAB = 64
MAX_POS = 16
HIDDEN = 128                  # multiple of 128 -> lane-dense stores
HEADS = 2
HEAD_DIM = HIDDEN // HEADS    # 64
INTERMEDIATE = 256            # multiple of 128
LAYERS = 2
LN_EPS = 1e-5
BATCH = 2
SEQ = 8
NEG_INF = -1e9                # finite "minus infinity" for additive masks
SOFTMAX_APPROX_RECIP = True   # EUP approx reciprocal in softmax denom (set False for exact)


# ============================ fused whole-tower Pallas kernel ============================

def _layernorm_f32(x, g, b):
    """x: [M, D] f32; g, b: [1, D] f32."""
    mu = jnp.mean(x, axis=-1, keepdims=True)
    var = jnp.mean(jnp.square(x - mu), axis=-1, keepdims=True)
    return (x - mu) * jax.lax.rsqrt(var + LN_EPS) * g + b


def _tower_kernel(h0_ref, pad_ref,
                  ln1_g_ref, ln1_b_ref, qkv_w_ref, qkv_b_ref,
                  o_w_ref, o_b_ref,
                  ln2_g_ref, ln2_b_ref, fc1_w_ref, fc1_b_ref,
                  fc2_w_ref, fc2_b_ref,
                  fln_g_ref, fln_b_ref,
                  out_ref):
    B, S, D, H, Dh = BATCH, SEQ, HIDDEN, HEADS, HEAD_DIM
    M = B * S

    # ---- causal + key-padding additive mask, built in-kernel, hoisted above the loop ----
    q_idx = jax.lax.broadcasted_iota(jnp.int32, (S, S), 0)
    k_idx = jax.lax.broadcasted_iota(jnp.int32, (S, S), 1)
    causal = q_idx >= k_idx                                   # [S, S] bool
    key_ok = pad_ref[...] > 0.5                               # [B, S] bool (1=keep, 0=pad)
    allowed = jnp.logical_and(causal[None, :, :], key_ok[:, None, :])   # [B, S, S]
    mask = jnp.where(allowed, 0.0, NEG_INF).astype(jnp.float32)

    def layer_body(l, h):
        # ---------------- self-attention block (pre-LN), residual fused ----------------
        x = _layernorm_f32(h, ln1_g_ref[l], ln1_b_ref[l])
        qkv = jnp.dot(x.astype(jnp.bfloat16), qkv_w_ref[l],            # fused Q/K/V proj
                      preferred_element_type=jnp.float32) + qkv_b_ref[l]   # [M, 3D] f32
        # lane-aligned 128-wide slabs (scale is pre-folded into the Q weights/bias)
        q = qkv[:, 0 * D:1 * D]
        k = qkv[:, 1 * D:2 * D]
        v = qkv[:, 2 * D:3 * D]

        o_w_l = o_w_ref[l]                                    # [D, D] bf16
        attn = jnp.zeros((M, D), jnp.float32)
        # Static unroll over H=2 heads; the head concat is fused into the o-projection
        # by accumulating per-head [M, Dh] @ [Dh, D] into a full-lane [M, D] slab.
        for hh in range(H):
            q_h = q[:, hh * Dh:(hh + 1) * Dh].reshape(B, S, Dh)
            k_h = k[:, hh * Dh:(hh + 1) * Dh].reshape(B, S, Dh)
            v_h = v[:, hh * Dh:(hh + 1) * Dh].reshape(B, S, Dh)

            s = jnp.einsum('bqd,bkd->bqk',
                           q_h.astype(jnp.bfloat16), k_h.astype(jnp.bfloat16),
                           preferred_element_type=jnp.float32) + mask   # [B, S, S]
            s = s - jnp.max(s, axis=-1, keepdims=True)
            p = jnp.exp(s)
            denom = jnp.sum(p, axis=-1, keepdims=True)
            if SOFTMAX_APPROX_RECIP:
                p = p * pl.reciprocal(denom, approx=True)
            else:
                p = p / denom
            o_h = jnp.einsum('bqk,bkd->bqd',
                             p.astype(jnp.bfloat16), v_h.astype(jnp.bfloat16),
                             preferred_element_type=jnp.float32).reshape(M, Dh)
            attn = attn + jnp.dot(o_h.astype(jnp.bfloat16),
                                  o_w_l[hh * Dh:(hh + 1) * Dh, :],
                                  preferred_element_type=jnp.float32)   # [M, D] full-lane
        h = h + attn + o_b_ref[l]                             # residual fused in-kernel

        # ---------------- MLP block (pre-LN, quick_gelu), residual fused ----------------
        x = _layernorm_f32(h, ln2_g_ref[l], ln2_b_ref[l])
        f = jnp.dot(x.astype(jnp.bfloat16), fc1_w_ref[l],
                    preferred_element_type=jnp.float32) + fc1_b_ref[l]
        f = f * jax.nn.sigmoid(1.702 * f)                     # CLIP quick_gelu (f32, EUP)
        m = jnp.dot(f.astype(jnp.bfloat16), fc2_w_ref[l],
                    preferred_element_type=jnp.float32) + fc2_b_ref[l]
        return h + m

    h = jax.lax.fori_loop(0, LAYERS, layer_body, h0_ref[...].astype(jnp.float32),
                          unroll=True)

    # Final LayerNorm in f32, stored as bf16 (lane-dense [M, 128] slab).
    out_ref[...] = _layernorm_f32(h, fln_g_ref[...], fln_b_ref[...]).astype(out_ref.dtype)


def _tower_pallas(h0, pad, params):
    """h0: [B*S, D] f32, pad: [B, S] f32 key-padding (1=keep) -> last_hidden [B*S, D] bf16."""
    M, D = h0.shape
    vmem = pl.BlockSpec(memory_space=pltpu.MemorySpace.VMEM)   # whole array resident in VMEM
    return pl.pallas_call(
        _tower_kernel,
        out_shape=jax.ShapeDtypeStruct((M, D), jnp.bfloat16),
        in_specs=[vmem] * 16,
        out_specs=vmem,
        # No grid: one invocation, no per-step overhead.  Default scoped-VMEM limit is
        # ample for the <1 MiB footprint (do NOT blanket-request 64 MiB; that's all of
        # v7x's physical VMEM).
    )(h0, pad,
      params["ln1_g"], params["ln1_b"], params["qkv_w"], params["qkv_b"],
      params["o_w"], params["o_b"],
      params["ln2_g"], params["ln2_b"], params["fc1_w"], params["fc1_b"],
      params["fc2_w"], params["fc2_b"],
      params["final_ln_g"], params["final_ln_b"])


# ============================ parameter init (stacked per layer) ============================

def init_params(key):
    D, I, L, Dh = HIDDEN, INTERMEDIATE, LAYERS, HEAD_DIM
    k = jax.random.split(key, 9)

    def w(kk, shape, scale=0.02):
        return scale * jax.random.normal(kk, shape, jnp.float32)

    # Fold the attention scale (Dh**-0.5) into the Q columns of the fused QKV projection
    # (weight AND bias) so the kernel never multiplies scores by `scale`.
    scale = Dh ** -0.5
    qkv_w = w(k[2], (L, D, 3 * D))
    qkv_w = qkv_w.at[:, :, :D].multiply(scale)
    qkv_b = w(k[3], (L, 1, 3 * D), 0.01)
    qkv_b = qkv_b.at[:, :, :D].multiply(scale)

    return {
        "token_embedding": w(k[0], (VOCAB, D)),
        "position_embedding": w(k[1], (MAX_POS, D)),
        # matmul weights stored bf16 (MXU inputs); biases / LN params stay f32.
        # TODO(synk): at production scale consider fp8 weights on v7x / int8 on v5e-v6e.
        "qkv_w": qkv_w.astype(jnp.bfloat16),
        "qkv_b": qkv_b,
        "o_w": w(k[4], (L, D, D)).astype(jnp.bfloat16),
        "o_b": w(k[5], (L, 1, D), 0.01),
        "fc1_w": w(k[6], (L, D, I)).astype(jnp.bfloat16),
        "fc1_b": w(k[7], (L, 1, I), 0.01),
        "fc2_w": w(k[8], (L, I, D)).astype(jnp.bfloat16),
        "fc2_b": jnp.zeros((L, 1, D), jnp.float32),
        "ln1_g": jnp.ones((L, 1, D), jnp.float32), "ln1_b": jnp.zeros((L, 1, D), jnp.float32),
        "ln2_g": jnp.ones((L, 1, D), jnp.float32), "ln2_b": jnp.zeros((L, 1, D), jnp.float32),
        "final_ln_g": jnp.ones((1, D), jnp.float32), "final_ln_b": jnp.zeros((1, D), jnp.float32),
    }


# ============================ forward pass ============================

@functools.partial(jax.jit, static_argnames=("return_hidden_states",))
def clip_text_tower_forward(params, input_ids, attention_mask, return_hidden_states=False):
    B, S = input_ids.shape
    D = HIDDEN

    # Embeddings (gathers = glue, plain JAX).
    h = jnp.take(params["token_embedding"], input_ids, axis=0)      # [B, S, D]
    h = h + params["position_embedding"][:S][None, :, :]
    h0 = h.reshape(B * S, D).astype(jnp.float32)

    # Only the tiny [B, S] key-padding row is shipped; causal+padding mask is built in-kernel.
    pad = attention_mask.astype(jnp.float32)                         # [B, S], 1=keep 0=pad

    last_hidden = _tower_pallas(h0, pad, params).reshape(B, S, D)    # bf16

    # pooler_output = hidden state at the EOT token (argmax of input_ids; matches
    # the classic HF CLIP pooling — assumes EOT has the max token id).
    eot_idx = jnp.argmax(input_ids, axis=-1)                         # [B]
    pooled = last_hidden[jnp.arange(B), eot_idx]                     # [B, D]

    if return_hidden_states:
        return [last_hidden, pooled]
    return pooled


# ============================ pure-JAX reference (same bf16 casts, f32 output) ============================

def clip_text_tower_reference(params, input_ids, attention_mask):
    B, S = input_ids.shape
    D, H, Dh = HIDDEN, HEADS, HEAD_DIM

    def ln(x, g, b):
        mu = jnp.mean(x, -1, keepdims=True)
        var = jnp.mean(jnp.square(x - mu), -1, keepdims=True)
        return (x - mu) * jax.lax.rsqrt(var + LN_EPS) * g + b

    h = jnp.take(params["token_embedding"], input_ids, axis=0)
    h = (h + params["position_embedding"][:S][None]).reshape(B * S, D)
    causal = jnp.tril(jnp.ones((S, S), dtype=bool))
    allowed = causal[None] & (attention_mask[:, None, :] > 0)
    mask = jnp.where(allowed, 0.0, NEG_INF).astype(jnp.float32)

    for l in range(LAYERS):
        x = ln(h, params["ln1_g"][l], params["ln1_b"][l])
        qkv = jnp.dot(x.astype(jnp.bfloat16), params["qkv_w"][l],
                      preferred_element_type=jnp.float32) + params["qkv_b"][l]
        outs = []
        for hh in range(H):
            # NOTE: attention scale is pre-folded into qkv_w/qkv_b Q columns at init.
            q = qkv[:, hh * Dh:(hh + 1) * Dh].reshape(B, S, Dh)
            k = qkv[:, D + hh * Dh:D + (hh + 1) * Dh].reshape(B, S, Dh)
            v = qkv[:, 2 * D + hh * Dh:2 * D + (hh + 1) * Dh].reshape(B, S, Dh)
            s = jnp.einsum('bqd,bkd->bqk', q.astype(jnp.bfloat16), k.astype(jnp.bfloat16),
                           preferred_element_type=jnp.float32) + mask
            p = jax.nn.softmax(s, axis=-1)
            o = jnp.einsum('bqk,bkd->bqd', p.astype(jnp.bfloat16), v.astype(jnp.bfloat16),
                           preferred_element_type=jnp.float32)
            outs.append(o.reshape(B * S, Dh))
        a = jnp.concatenate(outs, axis=-1)
        a = jnp.dot(a.astype(jnp.bfloat16), params["o_w"][l],
                    preferred_element_type=jnp.float32) + params["o_b"][l]
        h = h + a
        x = ln(h, params["ln2_g"][l], params["ln2_b"][l])
        f = jnp.dot(x.astype(jnp.bfloat16), params["fc1_w"][l],
                    preferred_element_type=jnp.float32) + params["fc1_b"][l]
        f = f * jax.nn.sigmoid(1.702 * f)
        m = jnp.dot(f.astype(jnp.bfloat16), params["fc2_w"][l],
                    preferred_element_type=jnp.float32) + params["fc2_b"][l]
        h = h + m

    last = ln(h, params["final_ln_g"], params["final_ln_b"]).reshape(B, S, D)
    eot = jnp.argmax(input_ids, -1)
    return last, last[jnp.arange(B), eot]


# ============================ main ============================

if __name__ == "__main__":
    key = jax.random.PRNGKey(0)
    pkey, ikey = jax.random.split(key)
    params = init_params(pkey)

    input_ids = jax.random.randint(ikey, (BATCH, SEQ), 0, VOCAB, dtype=jnp.int32)
    # exercise the padding-mask path: last two tokens of sequence 1 are padding
    attention_mask = jnp.ones((BATCH, SEQ), dtype=jnp.int32).at[1, -2:].set(0)

    # forward(text_inputs) -> pooler_output  (CLIPTextTower default path)
    text_features = clip_text_tower_forward(params, input_ids, attention_mask)
    jax.block_until_ready(text_features)

    # forward(text_inputs, return_hidden_states=True) -> [last_hidden_state, pooler_output]
    hidden, pooled = clip_text_tower_forward(
        params, input_ids, attention_mask, return_hidden_states=True)
    jax.block_until_ready(hidden)
    jax.block_until_ready(pooled)

    assert text_features.shape == (BATCH, HIDDEN)
    assert hidden.shape == (BATCH, SEQ, HIDDEN)
    assert pooled.shape == (BATCH, HIDDEN)

    # numerical check against a pure-JAX reference with the same bf16 matmul casts;
    # quantize the reference output to bf16 to compare apples-to-apples with the
    # kernel's bf16 writeback.
    ref_hidden, ref_pooled = clip_text_tower_reference(params, input_ids, attention_mask)
    ref_hidden_q = ref_hidden.astype(jnp.bfloat16).astype(jnp.float32)
    hid_f32 = hidden.astype(jnp.float32)
    max_err = float(jnp.max(jnp.abs(hid_f32 - ref_hidden_q)))
    assert jnp.all(jnp.isfinite(hid_f32)) and jnp.all(jnp.isfinite(pooled.astype(jnp.float32)))
    assert max_err < 5e-2, f"max abs error vs reference: {max_err}"

    print("KERNEL_OK")
</pallas_src>

<mosaic_0001>
module attributes {stable_mosaic.version = 11 : i64} {
  func.func @_tower_kernel(%arg0: memref<16x128xf32, #tpu.memory_space<vmem>>, %arg1: memref<2x8xf32, #tpu.memory_space<vmem>>, %arg2: memref<2x1x128xf32, #tpu.memory_space<vmem>>, %arg3: memref<2x1x128xf32, #tpu.memory_space<vmem>>, %arg4: memref<2x128x384xbf16, #tpu.memory_space<vmem>>, %arg5: memref<2x1x384xf32, #tpu.memory_space<vmem>>, %arg6: memref<2x128x128xbf16, #tpu.memory_space<vmem>>, %arg7: memref<2x1x128xf32, #tpu.memory_space<vmem>>, %arg8: memref<2x1x128xf32, #tpu.memory_space<vmem>>, %arg9: memref<2x1x128xf32, #tpu.memory_space<vmem>>, %arg10: memref<2x128x256xbf16, #tpu.memory_space<vmem>>, %arg11: memref<2x1x256xf32, #tpu.memory_space<vmem>>, %arg12: memref<2x256x128xbf16, #tpu.memory_space<vmem>>, %arg13: memref<2x1x128xf32, #tpu.memory_space<vmem>>, %arg14: memref<1x128xf32, #tpu.memory_space<vmem>>, %arg15: memref<1x128xf32, #tpu.memory_space<vmem>>, %arg16: memref<16x128xbf16, #tpu.memory_space<vmem>>) attributes {dimension_semantics = [], scalar_prefetch = 0 : i64, scratch_operands = 0 : i64, tpu.core_type = #tpu.core_type<tc>} {
    %0 = tpu.iota {dimensions = array<i32: 0>} : vector<8x8xi32>
    %1 = tpu.iota {dimensions = array<i32: 1>} : vector<8x8xi32>
    %2 = arith.cmpi sge, %0, %1 : vector<8x8xi32>
    %c0 = arith.constant 0 : index
    %c0_0 = arith.constant 0 : index
    %3 = vector.load %arg1[%c0, %c0_0] : memref<2x8xf32, #tpu.memory_space<vmem>>, vector<2x8xf32>
    %cst = arith.constant 5.000000e-01 : f32
    %4 = vector.broadcast %cst : f32 to vector<2x8xf32>
    %5 = arith.cmpf ogt, %3, %4 : vector<2x8xf32>
    %6 = vector.shape_cast %2 : vector<8x8xi1> to vector<1x8x8xi1>
    %7 = vector.shape_cast %5 : vector<2x8xi1> to vector<2x1x8xi1>
    %8 = vector.broadcast %6 : vector<1x8x8xi1> to vector<2x8x8xi1>
    %9 = vector.broadcast %7 : vector<2x1x8xi1> to vector<2x8x8xi1>
    %10 = arith.andi %8, %9 : vector<2x8x8xi1>
    %cst_1 = arith.constant 0.000000e+00 : f32
    %cst_2 = arith.constant -1.000000e+09 : f32
    %11 = vector.broadcast %cst_1 : f32 to vector<2x8x8xf32>
    %12 = vector.broadcast %cst_2 : f32 to vector<2x8x8xf32>
    %13 = arith.select %10, %11, %12 : vector<2x8x8xi1>, vector<2x8x8xf32>
    %c0_3 = arith.constant 0 : index
    %c0_4 = arith.constant 0 : index
    %14 = vector.load %arg0[%c0_3, %c0_4] : memref<16x128xf32, #tpu.memory_space<vmem>>, vector<16x128xf32>
    %c0_i32 = arith.constant 0 : i32
    %15 = arith.index_cast %c0_i32 : i32 to index
    %c0_5 = arith.constant 0 : index
    %c0_6 = arith.constant 0 : index
    %16 = vector.load %arg2[%15, %c0_5, %c0_6] : memref<2x1x128xf32, #tpu.memory_space<vmem>>, vector<1x1x128xf32>
    %17 = vector.shape_cast %16 : vector<1x1x128xf32> to vector<1x128xf32>
    %18 = arith.index_cast %c0_i32 : i32 to index
    %c0_7 = arith.constant 0 : index
    %c0_8 = arith.constant 0 : index
    %19 = vector.load %arg3[%18, %c0_7, %c0_8] : memref<2x1x128xf32, #tpu.memory_space<vmem>>, vector<1x1x128xf32>
    %20 = vector.shape_cast %19 : vector<1x1x128xf32> to vector<1x128xf32>
    %cst_9 = arith.constant dense<0.000000e+00> : vector<16xf32>
    %21 = vector.multi_reduction <add>, %14, %cst_9 [1] : vector<16x128xf32> to vector<16xf32>
    %22 = vector.shape_cast %21 : vector<16xf32> to vector<16x1xf32>
    %cst_10 = arith.constant 1.280000e+02 : f32
    %23 = vector.broadcast %cst_10 : f32 to vector<16x1xf32>
    %24 = arith.divf %22, %23 : vector<16x1xf32>
    %25 = vector.broadcast %24 : vector<16x1xf32> to vector<16x128xf32>
    %26 = arith.subf %14, %25 : vector<16x128xf32>
    %27 = arith.mulf %26, %26 : vector<16x128xf32>
    %cst_11 = arith.constant dense<0.000000e+00> : vector<16xf32>
    %28 = vector.multi_reduction <add>, %27, %cst_11 [1] : vector<16x128xf32> to vector<16xf32>
    %29 = vector.shape_cast %28 : vector<16xf32> to vector<16x1xf32>
    %cst_12 = arith.constant 1.280000e+02 : f32
    %30 = vector.broadcast %cst_12 : f32 to vector<16x1xf32>
    %31 = arith.divf %29, %30 : vector<16x1xf32>
    %32 = vector.broadcast %24 : vector<16x1xf32> to vector<16x128xf32>
    %33 = arith.subf %14, %32 : vector<16x128xf32>
    %cst_13 = arith.constant 9.99999974E-6 : f32
    %34 = vector.broadcast %cst_13 : f32 to vector<16x1xf32>
    %35 = arith.addf %31, %34 : vector<16x1xf32>
    %36 = math.rsqrt %35 : vector<16x1xf32>
    %37 = vector.broadcast %36 : vector<16x1xf32> to vector<16x128xf32>
    %38 = arith.mulf %33, %37 : vector<16x128xf32>
    %39 = vector.broadcast %17 : vector<1x128xf32> to vector<16x128xf32>
    %40 = arith.mulf %38, %39 : vector<16x128xf32>
    %41 = vector.broadcast %20 : vector<1x128xf32> to vector<16x128xf32>
    %42 = arith.addf %40, %41 : vector<16x128xf32>
    %43 = arith.truncf %42 : vector<16x128xf32> to vector<16x128xbf16>
    %44 = arith.index_cast %c0_i32 : i32 to index
    %c0_14 = arith.constant 0 : index
    %c0_15 = arith.constant 0 : index
    %45 = vector.load %arg4[%44, %c0_14, %c0_15] : memref<2x128x384xbf16, #tpu.memory_space<vmem>>, vector<1x128x384xbf16>
    %46 = vector.shape_cast %45 : vector<1x128x384xbf16> to vector<128x384xbf16>
    %cst_16 = arith.constant dense<0.000000e+00> : vector<16x384xf32>
    %47 = tpu.matmul %43, %46, %cst_16 {dimension_numbers = #tpu.dot_dimension_numbers<[1], [0], [0], [1], [0, 0, 1, 1], [], []>} : vector<16x128xbf16>, vector<128x384xbf16>, vector<16x384xf32> -> vector<16x384xf32>
    %48 = arith.index_cast %c0_i32 : i32 to index
    %c0_17 = arith.constant 0 : index
    %c0_18 = arith.constant 0 : index
    %49 = vector.load %arg5[%48, %c0_17, %c0_18] : memref<2x1x384xf32, #tpu.memory_space<vmem>>, vector<1x1x384xf32>
    %50 = vector.shape_cast %49 : vector<1x1x384xf32> to vector<1x384xf32>
    %51 = vector.broadcast %50 : vector<1x384xf32> to vector<16x384xf32>
    %52 = arith.addf %47, %51 : vector<16x384xf32>
    %53 = vector.extract_strided_slice %52 {offsets = [0, 0], sizes = [16, 128], strides = [1, 1]} : vector<16x384xf32> to vector<16x128xf32>
    %54 = vector.extract_strided_slice %52 {offsets = [0, 128], sizes = [16, 128], strides = [1, 1]} : vector<16x384xf32> to vector<16x128xf32>
    %55 = vector.extract_strided_slice %52 {offsets = [0, 256], sizes = [16, 128], strides = [1, 1]} : vector<16x384xf32> to vector<16x128xf32>
    %56 = arith.index_cast %c0_i32 : i32 to index
    %c0_19 = arith.constant 0 : index
    %c0_20 = arith.constant 0 : index
    %57 = vector.load %arg6[%56, %c0_19, %c0_20] : memref<2x128x128xbf16, #tpu.memory_space<vmem>>, vector<1x128x128xbf16>
    %58 = vector.shape_cast %57 : vector<1x128x128xbf16> to vector<128x128xbf16>
    %cst_21 = arith.constant 0.000000e+00 : f32
    %59 = vector.broadcast %cst_21 : f32 to vector<16x128xf32>
    %60 = vector.extract_strided_slice %53 {offsets = [0, 0], sizes = [16, 64], strides = [1, 1]} : vector<16x128xf32> to vector<16x64xf32>
    %61 = vector.shape_cast %60 : vector<16x64xf32> to vector<2x8x64xf32>
    %62 = vector.extract_strided_slice %54 {offsets = [0, 0], sizes = [16, 64], strides = [1, 1]} : vector<16x128xf32> to vector<16x64xf32>
    %63 = vector.shape_cast %62 : vector<16x64xf32> to vector<2x8x64xf32>
    %64 = vector.extract_strided_slice %55 {offsets = [0, 0], sizes = [16, 64], strides = [1, 1]} : vector<16x128xf32> to vector<16x64xf32>
    %65 = vector.shape_cast %64 : vector<16x64xf32> to vector<2x8x64xf32>
    %66 = arith.truncf %61 : vector<2x8x64xf32> to vector<2x8x64xbf16>
    %67 = arith.truncf %63 : vector<2x8x64xf32> to vector<2x8x64xbf16>
    "tpu.trace_start"() <{level = 10 : i32, message = "bqd,bkd->bqk"}> : () -> ()
    %cst_22 = arith.constant dense<0.000000e+00> : vector<2x8x8xf32>
    %68 = tpu.matmul %66, %67, %cst_22 {dimension_numbers = #tpu.dot_dimension_numbers<[2], [2], [1], [1], [0, 0, 0, 1, 1, 1], [0], [0]>} : vector<2x8x64xbf16>, vector<2x8x64xbf16>, vector<2x8x8xf32> -> vector<2x8x8xf32>
    "tpu.trace_stop"() : () -> ()
    %69 = arith.addf %68, %13 : vector<2x8x8xf32>
    %cst_23 = arith.constant dense<0xFF800000> : vector<2x8xf32>
    %70 = vector.multi_reduction <maximumf>, %69, %cst_23 [2] : vector<2x8x8xf32> to vector<2x8xf32>
    %71 = vector.shape_cast %70 : vector<2x8xf32> to vector<2x8x1xf32>
    %72 = vector.broadcast %71 : vector<2x8x1xf32> to vector<2x8x8xf32>
    %73 = arith.subf %69, %72 : vector<2x8x8xf32>
    %74 = math.exp %73 : vector<2x8x8xf32>
    %cst_24 = arith.constant dense<0.000000e+00> : vector<2x8xf32>
    %75 = vector.multi_reduction <add>, %74, %cst_24 [2] : vector<2x8x8xf32> to vector<2x8xf32>
    %76 = vector.shape_cast %75 : vector<2x8xf32> to vector<2x8x1xf32>
    %77 = tpu.reciprocal %76 {approx = true} : vector<2x8x1xf32> -> vector<2x8x1xf32>
    %78 = vector.broadcast %77 : vector<2x8x1xf32> to vector<2x8x8xf32>
    %79 = arith.mulf %74, %78 : vector<2x8x8xf32>
    %80 = arith.truncf %79 : vector<2x8x8xf32> to vector<2x8x8xbf16>
    %81 = arith.truncf %65 : vector<2x8x64xf32> to vector<2x8x64xbf16>
    "tpu.trace_start"() <{level = 10 : i32, message = "bqk,bkd->bqd"}> : () -> ()
    %cst_25 = arith.constant dense<0.000000e+00> : vector<2x8x64xf32>
    %82 = tpu.matmul %80, %81, %cst_25 {dimension_numbers = #tpu.dot_dimension_numbers<[2], [1], [1], [2], [0, 0, 0, 1, 1, 2], [0], [0]>} : vector<2x8x8xbf16>, vector<2x8x64xbf16>, vector<2x8x64xf32> -> vector<2x8x64xf32>
    "tpu.trace_stop"() : () -> ()
    %83 = vector.shape_cast %82 : vector<2x8x64xf32> to vector<16x64xf32>
    %84 = arith.truncf %83 : vector<16x64xf32> to vector<16x64xbf16>
    %85 = vector.extract_strided_slice %58 {offsets = [0, 0], sizes = [64, 128], strides = [1, 1]} : vector<128x128xbf16> to vector<64x128xbf16>
    %cst_26 = arith.constant dense<0.000000e+00> : vector<16x128xf32>
    %86 = tpu.matmul %84, %85, %cst_26 {dimension_numbers = #tpu.dot_dimension_numbers<[1], [0], [0], [1], [0, 0, 1, 1], [], []>} : vector<16x64xbf16>, vector<64x128xbf16>, vector<16x128xf32> -> vector<16x128xf32>
    %87 = arith.addf %59, %86 : vector<16x128xf32>
    %88 = vector.extract_strided_slice %53 {offsets = [0, 64], sizes = [16, 64], strides = [1, 1]} : vector<16x128xf32> to vector<16x64xf32>
    %89 = vector.shape_cast %88 : vector<16x64xf32> to vector<2x8x64xf32>
    %90 = vector.extract_strided_slice %54 {offsets = [0, 64], sizes = [16, 64], strides = [1, 1]} : vector<16x128xf32> to vector<16x64xf32>
    %91 = vector.shape_cast %90 : vector<16x64xf32> to vector<2x8x64xf32>
    %92 = vector.extract_strided_slice %55 {offsets = [0, 64], sizes = [16, 64], strides = [1, 1]} : vector<16x128xf32> to vector<16x64xf32>
    %93 = vector.shape_cast %92 : vector<16x64xf32> to vector<2x8x64xf32>
    %94 = arith.truncf %89 : vector<2x8x64xf32> to vector<2x8x64xbf16>
    %95 = arith.truncf %91 : vector<2x8x64xf32> to vector<2x8x64xbf16>
    "tpu.trace_start"() <{level = 10 : i32, message = "bqd,bkd->bqk"}> : () -> ()
    %cst_27 = arith.constant dense<0.000000e+00> : vector<2x8x8xf32>
    %96 = tpu.matmul %94, %95, %cst_27 {dimension_numbers = #tpu.dot_dimension_numbers<[2], [2], [1], [1], [0, 0, 0, 1, 1, 1], [0], [0]>} : vector<2x8x64xbf16>, vector<2x8x64xbf16>, vector<2x8x8xf32> -> vector<2x8x8xf32>
    "tpu.trace_stop"() : () -> ()
    %97 = arith.addf %96, %13 : vector<2x8x8xf32>
    %cst_28 = arith.constant dense<0xFF800000> : vector<2x8xf32>
    %98 = vector.multi_reduction <maximumf>, %97, %cst_28 [2] : vector<2x8x8xf32> to vector<2x8xf32>
    %99 = vector.shape_cast %98 : vector<2x8xf32> to vector<2x8x1xf32>
    %100 = vector.broadcast %99 : vector<2x8x1xf32> to vector<2x8x8xf32>
    %101 = arith.subf %97, %100 : vector<2x8x8xf32>
    %102 = math.exp %101 : vector<2x8x8xf32>
    %cst_29 = arith.constant dense<0.000000e+00> : vector<2x8xf32>
    %103 = vector.multi_reduction <add>, %102, %cst_29 [2] : vector<2x8x8xf32> to vector<2x8xf32>
    %104 = vector.shape_cast %103 : vector<2x8xf32> to vector<2x8x1xf32>
    %105 = tpu.reciprocal %104 {approx = true} : vector<2x8x1xf32> -> vector<2x8x1xf32>
    %106 = vector.broadcast %105 : vector<2x8x1xf32> to vector<2x8x8xf32>
    %107 = arith.mulf %102, %106 : vector<2x8x8xf32>
    %108 = arith.truncf %107 : vector<2x8x8xf32> to vector<2x8x8xbf16>
    %109 = arith.truncf %93 : vector<2x8x64xf32> to vector<2x8x64xbf16>
    "tpu.trace_start"() <{level = 10 : i32, message = "bqk,bkd->bqd"}> : () -> ()
    %cst_30 = arith.constant dense<0.000000e+00> : vector<2x8x64xf32>
    %110 = tpu.matmul %108, %109, %cst_30 {dimension_numbers = #tpu.dot_dimension_numbers<[2], [1], [1], [2], [0, 0, 0, 1, 1, 2], [0], [0]>} : vector<2x8x8xbf16>, vector<2x8x64xbf16>, vector<2x8x64xf32> -> vector<2x8x64xf32>
    "tpu.trace_stop"() : () -> ()
    %111 = vector.shape_cast %110 : vector<2x8x64xf32> to vector<16x64xf32>
    %112 = arith.truncf %111 : vector<16x64xf32> to vector<16x64xbf16>
    %113 = vector.extract_strided_slice %58 {offsets = [64, 0], sizes = [64, 128], strides = [1, 1]} : vector<128x128xbf16> to vector<64x128xbf16>
    %cst_31 = arith.constant dense<0.000000e+00> : vector<16x128xf32>
    %114 = tpu.matmul %112, %113, %cst_31 {dimension_numbers = #tpu.dot_dimension_numbers<[1], [0], [0], [1], [0, 0, 1, 1], [], []>} : vector<16x64xbf16>, vector<64x128xbf16>, vector<16x128xf32> -> vector<16x128xf32>
    %115 = arith.addf %87, %114 : vector<16x128xf32>
    %116 = arith.addf %14, %115 : vector<16x128xf32>
    %117 = arith.index_cast %c0_i32 : i32 to index
    %c0_32 = arith.constant 0 : index
    %c0_33 = arith.constant 0 : index
    %118 = vector.load %arg7[%117, %c0_32, %c0_33] : memref<2x1x128xf32, #tpu.memory_space<vmem>>, vector<1x1x128xf32>
    %119 = vector.shape_cast %118 : vector<1x1x128xf32> to vector<1x128xf32>
    %120 = vector.broadcast %119 : vector<1x128xf32> to vector<16x128xf32>
    %121 = arith.addf %116, %120 : vector<16x128xf32>
    %122 = arith.index_cast %c0_i32 : i32 to index
    %c0_34 = arith.constant 0 : index
    %c0_35 = arith.constant 0 : index
    %123 = vector.load %arg8[%122, %c0_34, %c0_35] : memref<2x1x128xf32, #tpu.memory_space<vmem>>, vector<1x1x128xf32>
    %124 = vector.shape_cast %123 : vector<1x1x128xf32> to vector<1x128xf32>
    %125 = arith.index_cast %c0_i32 : i32 to index
    %c0_36 = arith.constant 0 : index
    %c0_37 = arith.constant 0 : index
    %126 = vector.load %arg9[%125, %c0_36, %c0_37] : memref<2x1x128xf32, #tpu.memory_space<vmem>>, vector<1x1x128xf32>
    %127 = vector.shape_cast %126 : vector<1x1x128xf32> to vector<1x128xf32>
    %cst_38 = arith.constant dense<0.000000e+00> : vector<16xf32>
    %128 = vector.multi_reduction <add>, %121, %cst_38 [1] : vector<16x128xf32> to vector<16xf32>
    %129 = vector.shape_cast %128 : vector<16xf32> to vector<16x1xf32>
    %cst_39 = arith.constant 1.280000e+02 : f32
    %130 = vector.broadcast %cst_39 : f32 to vector<16x1xf32>
    %131 = arith.divf %129, %130 : vector<16x1xf32>
    %132 = vector.broadcast %131 : vector<16x1xf32> to vector<16x128xf32>
    %133 = arith.subf %121, %132 : vector<16x128xf32>
    %134 = arith.mulf %133, %133 : vector<16x128xf32>
    %cst_40 = arith.constant dense<0.000000e+00> : vector<16xf32>
    %135 = vector.multi_reduction <add>, %134, %cst_40 [1] : vector<16x128xf32> to vector<16xf32>
    %136 = vector.shape_cast %135 : vector<16xf32> to vector<16x1xf32>
    %cst_41 = arith.constant 1.280000e+02 : f32
    %137 = vector.broadcast %cst_41 : f32 to vector<16x1xf32>
    %138 = arith.divf %136, %137 : vector<16x1xf32>
    %139 = vector.broadcast %131 : vector<16x1xf32> to vector<16x128xf32>
    %140 = arith.subf %121, %139 : vector<16x128xf32>
    %cst_42 = arith.constant 9.99999974E-6 : f32
    %141 = vector.broadcast %cst_42 : f32 to vector<16x1xf32>
    %142 = arith.addf %138, %141 : vector<16x1xf32>
    %143 = math.rsqrt %142 : vector<16x1xf32>
    %144 = vector.broadcast %143 : vector<16x1xf32> to vector<16x128xf32>
    %145 = arith.mulf %140, %144 : vector<16x128xf32>
    %146 = vector.broadcast %124 : vector<1x128xf32> to vector<16x128xf32>
    %147 = arith.mulf %145, %146 : vector<16x128xf32>
    %148 = vector.broadcast %127 : vector<1x128xf32> to vector<16x128xf32>
    %149 = arith.addf %147, %148 : vector<16x128xf32>
    %150 = arith.truncf %149 : vector<16x128xf32> to vector<16x128xbf16>
    %151 = arith.index_cast %c0_i32 : i32 to index
    %c0_43 = arith.constant 0 : index
    %c0_44 = arith.constant 0 : index
    %152 = vector.load %arg10[%151, %c0_43, %c0_44] : memref<2x128x256xbf16, #tpu.memory_space<vmem>>, vector<1x128x256xbf16>
    %153 = vector.shape_cast %152 : vector<1x128x256xbf16> to vector<128x256xbf16>
    %cst_45 = arith.constant dense<0.000000e+00> : vector<16x256xf32>
    %154 = tpu.matmul %150, %153, %cst_45 {dimension_numbers = #tpu.dot_dimension_numbers<[1], [0], [0], [1], [0, 0, 1, 1], [], []>} : vector<16x128xbf16>, vector<128x256xbf16>, vector<16x256xf32> -> vector<16x256xf32>
    %155 = arith.index_cast %c0_i32 : i32 to index
    %c0_46 = arith.constant 0 : index
    %c0_47 = arith.constant 0 : index
    %156 = vector.load %arg11[%155, %c0_46, %c0_47] : memref<2x1x256xf32, #tpu.memory_space<vmem>>, vector<1x1x256xf32>
    %157 = vector.shape_cast %156 : vector<1x1x256xf32> to vector<1x256xf32>
    %158 = vector.broadcast %157 : vector<1x256xf32> to vector<16x256xf32>
    %159 = arith.addf %154, %158 : vector<16x256xf32>
    %cst_48 = arith.constant 1.702000e+00 : f32
    %160 = vector.broadcast %cst_48 : f32 to vector<16x256xf32>
    %161 = arith.mulf %160, %159 : vector<16x256xf32>
    %162 = arith.negf %161 : vector<16x256xf32>
    %163 = math.exp %162 : vector<16x256xf32>
    %cst_49 = arith.constant 1.000000e+00 : f32
    %164 = vector.broadcast %cst_49 : f32 to vector<16x256xf32>
    %165 = arith.addf %164, %163 : vector<16x256xf32>
    %166 = arith.divf %164, %165 : vector<16x256xf32>
    %167 = arith.mulf %159, %166 : vector<16x256xf32>
    %168 = arith.truncf %167 : vector<16x256xf32> to vector<16x256xbf16>
    %169 = arith.index_cast %c0_i32 : i32 to index
    %c0_50 = arith.constant 0 : index
    %c0_51 = arith.constant 0 : index
    %170 = vector.load %arg12[%169, %c0_50, %c0_51] : memref<2x256x128xbf16, #tpu.memory_space<vmem>>, vector<1x256x128xbf16>
    %171 = vector.shape_cast %170 : vector<1x256x128xbf16> to vector<256x128xbf16>
    %cst_52 = arith.constant dense<0.000000e+00> : vector<16x128xf32>
    %172 = tpu.matmul %168, %171, %cst_52 {dimension_numbers = #tpu.dot_dimension_numbers<[1], [0], [0], [1], [0, 0, 1, 1], [], []>} : vector<16x256xbf16>, vector<256x128xbf16>, vector<16x128xf32> -> vector<16x128xf32>
    %173 = arith.index_cast %c0_i32 : i32 to index
    %c0_53 = arith.constant 0 : index
    %c0_54 = arith.constant 0 : index
    %174 = vector.load %arg13[%173, %c0_53, %c0_54] : memref<2x1x128xf32, #tpu.memory_space<vmem>>, vector<1x1x128xf32>
    %175 = vector.shape_cast %174 : vector<1x1x128xf32> to vector<1x128xf32>
    %176 = vector.broadcast %175 : vector<1x128xf32> to vector<16x128xf32>
    %177 = arith.addf %172, %176 : vector<16x128xf32>
    %178 = arith.addf %121, %177 : vector<16x128xf32>
    %c1_i32 = arith.constant 1 : i32
    %179 = arith.index_cast %c1_i32 : i32 to index
    %c0_55 = arith.constant 0 : index
    %c0_56 = arith.constant 0 : index
    %180 = vector.load %arg2[%179, %c0_55, %c0_56] : memref<2x1x128xf32, #tpu.memory_space<vmem>>, vector<1x1x128xf32>
    %181 = vector.shape_cast %180 : vector<1x1x128xf32> to vector<1x128xf32>
    %182 = arith.index_cast %c1_i32 : i32 to index
    %c0_57 = arith.constant 0 : index
    %c0_58 = arith.constant 0 : index
    %183 = vector.load %arg3[%182, %c0_57, %c0_58] : memref<2x1x128xf32, #tpu.memory_space<vmem>>, vector<1x1x128xf32>
    %184 = vector.shape_cast %183 : vector<1x1x128xf32> to vector<1x128xf32>
    %cst_59 = arith.constant dense<0.000000e+00> : vector<16xf32>
    %185 = vector.multi_reduction <add>, %178, %cst_59 [1] : vector<16x128xf32> to vector<16xf32>
    %186 = vector.shape_cast %185 : vector<16xf32> to vector<16x1xf32>
    %cst_60 = arith.constant 1.280000e+02 : f32
    %187 = vector.broadcast %cst_60 : f32 to vector<16x1xf32>
    %188 = arith.divf %186, %187 : vector<16x1xf32>
    %189 = vector.broadcast %188 : vector<16x1xf32> to vector<16x128xf32>
    %190 = arith.subf %178, %189 : vector<16x128xf32>
    %191 = arith.mulf %190, %190 : vector<16x128xf32>
    %cst_61 = arith.constant dense<0.000000e+00> : vector<16xf32>
    %192 = vector.multi_reduction <add>, %191, %cst_61 [1] : vector<16x128xf32> to vector<16xf32>
    %193 = vector.shape_cast %192 : vector<16xf32> to vector<16x1xf32>
    %cst_62 = arith.constant 1.280000e+02 : f32
    %194 = vector.broadcast %cst_62 : f32 to vector<16x1xf32>
    %195 = arith.divf %193, %194 : vector<16x1xf32>
    %196 = vector.broadcast %188 : vector<16x1xf32> to vector<16x128xf32>
    %197 = arith.subf %178, %196 : vector<16x128xf32>
    %cst_63 = arith.constant 9.99999974E-6 : f32
    %198 = vector.broadcast %cst_63 : f32 to vector<16x1xf32>
    %199 = arith.addf %195, %198 : vector<16x1xf32>
    %200 = math.rsqrt %199 : vector<16x1xf32>
    %201 = vector.broadcast %200 : vector<16x1xf32> to vector<16x128xf32>
    %202 = arith.mulf %197, %201 : vector<16x128xf32>
    %203 = vector.broadcast %181 : vector<1x128xf32> to vector<16x128xf32>
    %204 = arith.mulf %202, %203 : vector<16x128xf32>
    %205 = vector.broadcast %184 : vector<1x128xf32> to vector<16x128xf32>
    %206 = arith.addf %204, %205 : vector<16x128xf32>
    %207 = arith.truncf %206 : vector<16x128xf32> to vector<16x128xbf16>
    %208 = arith.index_cast %c1_i32 : i32 to index
    %c0_64 = arith.constant 0 : index
    %c0_65 = arith.constant 0 : index
    %209 = vector.load %arg4[%208, %c0_64, %c0_65] : memref<2x128x384xbf16, #tpu.memory_space<vmem>>, vector<1x128x384xbf16>
    %210 = vector.shape_cast %209 : vector<1x128x384xbf16> to vector<128x384xbf16>
    %cst_66 = arith.constant dense<0.000000e+00> : vector<16x384xf32>
    %211 = tpu.matmul %207, %210, %cst_66 {dimension_numbers = #tpu.dot_dimension_numbers<[1], [0], [0], [1], [0, 0, 1, 1], [], []>} : vector<16x128xbf16>, vector<128x384xbf16>, vector<16x384xf32> -> vector<16x384xf32>
    %212 = arith.index_cast %c1_i32 : i32 to index
    %c0_67 = arith.constant 0 : index
    %c0_68 = arith.constant 0 : index
    %213 = vector.load %arg5[%212, %c0_67, %c0_68] : memref<2x1x384xf32, #tpu.memory_space<vmem>>, vector<1x1x384xf32>
    %214 = vector.shape_cast %213 : vector<1x1x384xf32> to vector<1x384xf32>
    %215 = vector.broadcast %214 : vector<1x384xf32> to vector<16x384xf32>
    %216 = arith.addf %211, %215 : vector<16x384xf32>
    %217 = vector.extract_strided_slice %216 {offsets = [0, 0], sizes = [16, 128], strides = [1, 1]} : vector<16x384xf32> to vector<16x128xf32>
    %218 = vector.extract_strided_slice %216 {offsets = [0, 128], sizes = [16, 128], strides = [1, 1]} : vector<16x384xf32> to vector<16x128xf32>
    %219 = vector.extract_strided_slice %216 {offsets = [0, 256], sizes = [16, 128], strides = [1, 1]} : vector<16x384xf32> to vector<16x128xf32>
    %220 = arith.index_cast %c1_i32 : i32 to index
    %c0_69 = arith.constant 0 : index
    %c0_70 = arith.constant 0 : index
    %221 = vector.load %arg6[%220, %c0_69, %c0_70] : memref<2x128x128xbf16, #tpu.memory_space<vmem>>, vector<1x128x128xbf16>
    %222 = vector.shape_cast %221 : vector<1x128x128xbf16> to vector<128x128xbf16>
    %cst_71 = arith.constant 0.000000e+00 : f32
    %223 = vector.broadcast %cst_71 : f32 to vector<16x128xf32>
    %224 = vector.extract_strided_slice %217 {offsets = [0, 0], sizes = [16, 64], strides = [1, 1]} : vector<16x128xf32> to vector<16x64xf32>
    %225 = vector.shape_cast %224 : vector<16x64xf32> to vector<2x8x64xf32>
    %226 = vector.extract_strided_slice %218 {offsets = [0, 0], sizes = [16, 64], strides = [1, 1]} : vector<16x128xf32> to vector<16x64xf32>
    %227 = vector.shape_cast %226 : vector<16x64xf32> to vector<2x8x64xf32>
    %228 = vector.extract_strided_slice %219 {offsets = [0, 0], sizes = [16, 64], strides = [1, 1]} : vector<16x128xf32> to vector<16x64xf32>
    %229 = vector.shape_cast %228 : vector<16x64xf32> to vector<2x8x64xf32>
    %230 = arith.truncf %225 : vector<2x8x64xf32> to vector<2x8x64xbf16>
    %231 = arith.truncf %227 : vector<2x8x64xf32> to vector<2x8x64xbf16>
    "tpu.trace_start"() <{level = 10 : i32, message = "bqd,bkd->bqk"}> : () -> ()
    %cst_72 = arith.constant dense<0.000000e+00> : vector<2x8x8xf32>
    %232 = tpu.matmul %230, %231, %cst_72 {dimension_numbers = #tpu.dot_dimension_numbers<[2], [2], [1], [1], [0, 0, 0, 1, 1, 1], [0], [0]>} : vector<2x8x64xbf16>, vector<2x8x64xbf16>, vector<2x8x8xf32> -> vector<2x8x8xf32>
    "tpu.trace_stop"() : () -> ()
    %233 = arith.addf %232, %13 : vector<2x8x8xf32>
    %cst_73 = arith.constant dense<0xFF800000> : vector<2x8xf32>
    %234 = vector.multi_reduction <maximumf>, %233, %cst_73 [2] : vector<2x8x8xf32> to vector<2x8xf32>
    %235 = vector.shape_cast %234 : vector<2x8xf32> to vector<2x8x1xf32>
    %236 = vector.broadcast %235 : vector<2x8x1xf32> to vector<2x8x8xf32>
    %237 = arith.subf %233, %236 : vector<2x8x8xf32>
    %238 = math.exp %237 : vector<2x8x8xf32>
    %cst_74 = arith.constant dense<0.000000e+00> : vector<2x8xf32>
    %239 = vector.multi_reduction <add>, %238, %cst_74 [2] : vector<2x8x8xf32> to vector<2x8xf32>
    %240 = vector.shape_cast %239 : vector<2x8xf32> to vector<2x8x1xf32>
    %241 = tpu.reciprocal %240 {approx = true} : vector<2x8x1xf32> -> vector<2x8x1xf32>
    %242 = vector.broadcast %241 : vector<2x8x1xf32> to vector<2x8x8xf32>
    %243 = arith.mulf %238, %242 : vector<2x8x8xf32>
    %244 = arith.truncf %243 : vector<2x8x8xf32> to vector<2x8x8xbf16>
    %245 = arith.truncf %229 : vector<2x8x64xf32> to vector<2x8x64xbf16>
    "tpu.trace_start"() <{level = 10 : i32, message = "bqk,bkd->bqd"}> : () -> ()
    %cst_75 = arith.constant dense<0.000000e+00> : vector<2x8x64xf32>
    %246 = tpu.matmul %244, %245, %cst_75 {dimension_numbers = #tpu.dot_dimension_numbers<[2], [1], [1], [2], [0, 0, 0, 1, 1, 2], [0], [0]>} : vector<2x8x8xbf16>, vector<2x8x64xbf16>, vector<2x8x64xf32> -> vector<2x8x64xf32>
    "tpu.trace_stop"() : () -> ()
    %247 = vector.shape_cast %246 : vector<2x8x64xf32> to vector<16x64xf32>
    %248 = arith.truncf %247 : vector<16x64xf32> to vector<16x64xbf16>
    %249 = vector.extract_strided_slice %222 {offsets = [0, 0], sizes = [64, 128], strides = [1, 1]} : vector<128x128xbf16> to vector<64x128xbf16>
    %cst_76 = arith.constant dense<0.000000e+00> : vector<16x128xf32>
    %250 = tpu.matmul %248, %249, %cst_76 {dimension_numbers = #tpu.dot_dimension_numbers<[1], [0], [0], [1], [0, 0, 1, 1], [], []>} : vector<16x64xbf16>, vector<64x128xbf16>, vector<16x128xf32> -> vector<16x128xf32>
    %251 = arith.addf %223, %250 : vector<16x128xf32>
    %252 = vector.extract_strided_slice %217 {offsets = [0, 64], sizes = [16, 64], strides = [1, 1]} : vector<16x128xf32> to vector<16x64xf32>
    %253 = vector.shape_cast %252 : vector<16x64xf32> to vector<2x8x64xf32>
    %254 = vector.extract_strided_slice %218 {offsets = [0, 64], sizes = [16, 64], strides = [1, 1]} : vector<16x128xf32> to vector<16x64xf32>
    %255 = vector.shape_cast %254 : vector<16x64xf32> to vector<2x8x64xf32>
    %256 = vector.extract_strided_slice %219 {offsets = [0, 64], sizes = [16, 64], strides = [1, 1]} : vector<16x128xf32> to vector<16x64xf32>
    %257 = vector.shape_cast %256 : vector<16x64xf32> to vector<2x8x64xf32>
    %258 = arith.truncf %253 : vector<2x8x64xf32> to vector<2x8x64xbf16>
    %259 = arith.truncf %255 : vector<2x8x64xf32> to vector<2x8x64xbf16>
    "tpu.trace_start"() <{level = 10 : i32, message = "bqd,bkd->bqk"}> : () -> ()
    %cst_77 = arith.constant dense<0.000000e+00> : vector<2x8x8xf32>
    %260 = tpu.matmul %258, %259, %cst_77 {dimension_numbers = #tpu.dot_dimension_numbers<[2], [2], [1], [1], [0, 0, 0, 1, 1, 1], [0], [0]>} : vector<2x8x64xbf16>, vector<2x8x64xbf16>, vector<2x8x8xf32> -> vector<2x8x8xf32>
    "tpu.trace_stop"() : () -> ()
    %261 = arith.addf %260, %13 : vector<2x8x8xf32>
    %cst_78 = arith.constant dense<0xFF800000> : vector<2x8xf32>
    %262 = vector.multi_reduction <maximumf>, %261, %cst_78 [2] : vector<2x8x8xf32> to vector<2x8xf32>
    %263 = vector.shape_cast %262 : vector<2x8xf32> to vector<2x8x1xf32>
    %264 = vector.broadcast %263 : vector<2x8x1xf32> to vector<2x8x8xf32>
    %265 = arith.subf %261, %264 : vector<2x8x8xf32>
    %266 = math.exp %265 : vector<2x8x8xf32>
    %cst_79 = arith.constant dense<0.000000e+00> : vector<2x8xf32>
    %267 = vector.multi_reduction <add>, %266, %cst_79 [2] : vector<2x8x8xf32> to vector<2x8xf32>
    %268 = vector.shape_cast %267 : vector<2x8xf32> to vector<2x8x1xf32>
    %269 = tpu.reciprocal %268 {approx = true} : vector<2x8x1xf32> -> vector<2x8x1xf32>
    %270 = vector.broadcast %269 : vector<2x8x1xf32> to vector<2x8x8xf32>
    %271 = arith.mulf %266, %270 : vector<2x8x8xf32>
    %272 = arith.truncf %271 : vector<2x8x8xf32> to vector<2x8x8xbf16>
    %273 = arith.truncf %257 : vector<2x8x64xf32> to vector<2x8x64xbf16>
    "tpu.trace_start"() <{level = 10 : i32, message = "bqk,bkd->bqd"}> : () -> ()
    %cst_80 = arith.constant dense<0.000000e+00> : vector<2x8x64xf32>
    %274 = tpu.matmul %272, %273, %cst_80 {dimension_numbers = #tpu.dot_dimension_numbers<[2], [1], [1], [2], [0, 0, 0, 1, 1, 2], [0], [0]>} : vector<2x8x8xbf16>, vector<2x8x64xbf16>, vector<2x8x64xf32> -> vector<2x8x64xf32>
    "tpu.trace_stop"() : () -> ()
    %275 = vector.shape_cast %274 : vector<2x8x64xf32> to vector<16x64xf32>
    %276 = arith.truncf %275 : vector<16x64xf32> to vector<16x64xbf16>
    %277 = vector.extract_strided_slice %222 {offsets = [64, 0], sizes = [64, 128], strides = [1, 1]} : vector<128x128xbf16> to vector<64x128xbf16>
    %cst_81 = arith.constant dense<0.000000e+00> : vector<16x128xf32>
    %278 = tpu.matmul %276, %277, %cst_81 {dimension_numbers = #tpu.dot_dimension_numbers<[1], [0], [0], [1], [0, 0, 1, 1], [], []>} : vector<16x64xbf16>, vector<64x128xbf16>, vector<16x128xf32> -> vector<16x128xf32>
    %279 = arith.addf %251, %278 : vector<16x128xf32>
    %280 = arith.addf %178, %279 : vector<16x128xf32>
    %281 = arith.index_cast %c1_i32 : i32 to index
    %c0_82 = arith.constant 0 : index
    %c0_83 = arith.constant 0 : index
    %282 = vector.load %arg7[%281, %c0_82, %c0_83] : memref<2x1x128xf32, #tpu.memory_space<vmem>>, vector<1x1x128xf32>
    %283 = vector.shape_cast %282 : vector<1x1x128xf32> to vector<1x128xf32>
    %284 = vector.broadcast %283 : vector<1x128xf32> to vector<16x128xf32>
    %285 = arith.addf %280, %284 : vector<16x128xf32>
    %286 = arith.index_cast %c1_i32 : i32 to index
    %c0_84 = arith.constant 0 : index
    %c0_85 = arith.constant 0 : index
    %287 = vector.load %arg8[%286, %c0_84, %c0_85] : memref<2x1x128xf32, #tpu.memory_space<vmem>>, vector<1x1x128xf32>
    %288 = vector.shape_cast %287 : vector<1x1x128xf32> to vector<1x128xf32>
    %289 = arith.index_cast %c1_i32 : i32 to index
    %c0_86 = arith.constant 0 : index
    %c0_87 = arith.constant 0 : index
    %290 = vector.load %arg9[%289, %c0_86, %c0_87] : memref<2x1x128xf32, #tpu.memory_space<vmem>>, vector<1x1x128xf32>
    %291 = vector.shape_cast %290 : vector<1x1x128xf32> to vector<1x128xf32>
    %cst_88 = arith.constant dense<0.000000e+00> : vector<16xf32>
    %292 = vector.multi_reduction <add>, %285, %cst_88 [1] : vector<16x128xf32> to vector<16xf32>
    %293 = vector.shape_cast %292 : vector<16xf32> to vector<16x1xf32>
    %cst_89 = arith.constant 1.280000e+02 : f32
    %294 = vector.broadcast %cst_89 : f32 to vector<16x1xf32>
    %295 = arith.divf %293, %294 : vector<16x1xf32>
    %296 = vector.broadcast %295 : vector<16x1xf32> to vector<16x128xf32>
    %297 = arith.subf %285, %296 : vector<16x128xf32>
    %298 = arith.mulf %297, %297 : vector<16x128xf32>
    %cst_90 = arith.constant dense<0.000000e+00> : vector<16xf32>
    %299 = vector.multi_reduction <add>, %298, %cst_90 [1] : vector<16x128xf32> to vector<16xf32>
    %300 = vector.shape_cast %299 : vector<16xf32> to vector<16x1xf32>
    %cst_91 = arith.constant 1.280000e+02 : f32
    %301 = vector.broadcast %cst_91 : f32 to vector<16x1xf32>
    %302 = arith.divf %300, %301 : vector<16x1xf32>
    %303 = vector.broadcast %295 : vector<16x1xf32> to vector<16x128xf32>
    %304 = arith.subf %285, %303 : vector<16x128xf32>
    %cst_92 = arith.constant 9.99999974E-6 : f32
    %305 = vector.broadcast %cst_92 : f32 to vector<16x1xf32>
    %306 = arith.addf %302, %305 : vector<16x1xf32>
    %307 = math.rsqrt %306 : vector<16x1xf32>
    %308 = vector.broadcast %307 : vector<16x1xf32> to vector<16x128xf32>
    %309 = arith.mulf %304, %308 : vector<16x128xf32>
    %310 = vector.broadcast %288 : vector<1x128xf32> to vector<16x128xf32>
    %311 = arith.mulf %309, %310 : vector<16x128xf32>
    %312 = vector.broadcast %291 : vector<1x128xf32> to vector<16x128xf32>
    %313 = arith.addf %311, %312 : vector<16x128xf32>
    %314 = arith.truncf %313 : vector<16x128xf32> to vector<16x128xbf16>
    %315 = arith.index_cast %c1_i32 : i32 to index
    %c0_93 = arith.constant 0 : index
    %c0_94 = arith.constant 0 : index
    %316 = vector.load %arg10[%315, %c0_93, %c0_94] : memref<2x128x256xbf16, #tpu.memory_space<vmem>>, vector<1x128x256xbf16>
    %317 = vector.shape_cast %316 : vector<1x128x256xbf16> to vector<128x256xbf16>
    %cst_95 = arith.constant dense<0.000000e+00> : vector<16x256xf32>
    %318 = tpu.matmul %314, %317, %cst_95 {dimension_numbers = #tpu.dot_dimension_numbers<[1], [0], [0], [1], [0, 0, 1, 1], [], []>} : vector<16x128xbf16>, vector<128x256xbf16>, vector<16x256xf32> -> vector<16x256xf32>
    %319 = arith.index_cast %c1_i32 : i32 to index
    %c0_96 = arith.constant 0 : index
    %c0_97 = arith.constant 0 : index
    %320 = vector.load %arg11[%319, %c0_96, %c0_97] : memref<2x1x256xf32, #tpu.memory_space<vmem>>, vector<1x1x256xf32>
    %321 = vector.shape_cast %320 : vector<1x1x256xf32> to vector<1x256xf32>
    %322 = vector.broadcast %321 : vector<1x256xf32> to vector<16x256xf32>
    %323 = arith.addf %318, %322 : vector<16x256xf32>
    %cst_98 = arith.constant 1.702000e+00 : f32
    %324 = vector.broadcast %cst_98 : f32 to vector<16x256xf32>
    %325 = arith.mulf %324, %323 : vector<16x256xf32>
    %326 = arith.negf %325 : vector<16x256xf32>
    %327 = math.exp %326 : vector<16x256xf32>
    %cst_99 = arith.constant 1.000000e+00 : f32
    %328 = vector.broadcast %cst_99 : f32 to vector<16x256xf32>
    %329 = arith.addf %328, %327 : vector<16x256xf32>
    %330 = arith.divf %328, %329 : vector<16x256xf32>
    %331 = arith.mulf %323, %330 : vector<16x256xf32>
    %332 = arith.truncf %331 : vector<16x256xf32> to vector<16x256xbf16>
    %333 = arith.index_cast %c1_i32 : i32 to index
    %c0_100 = arith.constant 0 : index
    %c0_101 = arith.constant 0 : index
    %334 = vector.load %arg12[%333, %c0_100, %c0_101] : memref<2x256x128xbf16, #tpu.memory_space<vmem>>, vector<1x256x128xbf16>
    %335 = vector.shape_cast %334 : vector<1x256x128xbf16> to vector<256x128xbf16>
    %cst_102 = arith.constant dense<0.000000e+00> : vector<16x128xf32>
    %336 = tpu.matmul %332, %335, %cst_102 {dimension_numbers = #tpu.dot_dimension_numbers<[1], [0], [0], [1], [0, 0, 1, 1], [], []>} : vector<16x256xbf16>, vector<256x128xbf16>, vector<16x128xf32> -> vector<16x128xf32>
    %337 = arith.index_cast %c1_i32 : i32 to index
    %c0_103 = arith.constant 0 : index
    %c0_104 = arith.constant 0 : index
    %338 = vector.load %arg13[%337, %c0_103, %c0_104] : memref<2x1x128xf32, #tpu.memory_space<vmem>>, vector<1x1x128xf32>
    %339 = vector.shape_cast %338 : vector<1x1x128xf32> to vector<1x128xf32>
    %340 = vector.broadcast %339 : vector<1x128xf32> to vector<16x128xf32>
    %341 = arith.addf %336, %340 : vector<16x128xf32>
    %342 = arith.addf %285, %341 : vector<16x128xf32>
    %c2_i32 = arith.constant 2 : i32
    %c0_105 = arith.constant 0 : index
    %c0_106 = arith.constant 0 : index
    %343 = vector.load %arg14[%c0_105, %c0_106] : memref<1x128xf32, #tpu.memory_space<vmem>>, vector<1x128xf32>
    %c0_107 = arith.constant 0 : index
    %c0_108 = arith.constant 0 : index
    %344 = vector.load %arg15[%c0_107, %c0_108] : memref<1x128xf32, #tpu.memory_space<vmem>>, vector<1x128xf32>
    %cst_109 = arith.constant dense<0.000000e+00> : vector<16xf32>
    %345 = vector.multi_reduction <add>, %342, %cst_109 [1] : vector<16x128xf32> to vector<16xf32>
    %346 = vector.shape_cast %345 : vector<16xf32> to vector<16x1xf32>
    %cst_110 = arith.constant 1.280000e+02 : f32
    %347 = vector.broadcast %cst_110 : f32 to vector<16x1xf32>
    %348 = arith.divf %346, %347 : vector<16x1xf32>
    %349 = vector.broadcast %348 : vector<16x1xf32> to vector<16x128xf32>
    %350 = arith.subf %342, %349 : vector<16x128xf32>
    %351 = arith.mulf %350, %350 : vector<16x128xf32>
    %cst_111 = arith.constant dense<0.000000e+00> : vector<16xf32>
    %352 = vector.multi_reduction <add>, %351, %cst_111 [1] : vector<16x128xf32> to vector<16xf32>
    %353 = vector.shape_cast %352 : vector<16xf32> to vector<16x1xf32>
    %cst_112 = arith.constant 1.280000e+02 : f32
    %354 = vector.broadcast %cst_112 : f32 to vector<16x1xf32>
    %355 = arith.divf %353, %354 : vector<16x1xf32>
    %356 = vector.broadcast %348 : vector<16x1xf32> to vector<16x128xf32>
    %357 = arith.subf %342, %356 : vector<16x128xf32>
    %cst_113 = arith.constant 9.99999974E-6 : f32
    %358 = vector.broadcast %cst_113 : f32 to vector<16x1xf32>
    %359 = arith.addf %355, %358 : vector<16x1xf32>
    %360 = math.rsqrt %359 : vector<16x1xf32>
    %361 = vector.broadcast %360 : vector<16x1xf32> to vector<16x128xf32>
    %362 = arith.mulf %357, %361 : vector<16x128xf32>
    %363 = vector.broadcast %343 : vector<1x128xf32> to vector<16x128xf32>
    %364 = arith.mulf %362, %363 : vector<16x128xf32>
    %365 = vector.broadcast %344 : vector<1x128xf32> to vector<16x128xf32>
    %366 = arith.addf %364, %365 : vector<16x128xf32>
    %367 = arith.truncf %366 : vector<16x128xf32> to vector<16x128xbf16>
    %c0_114 = arith.constant 0 : index
    %c0_115 = arith.constant 0 : index
    %368 = vector.load %arg16[%c0_114, %c0_115] : memref<16x128xbf16, #tpu.memory_space<vmem>>, vector<16x128xbf16>
    tpu.vector_store %arg16[%c0_114, %c0_115], %367 {strides = array<i32>} : memref<16x128xbf16, #tpu.memory_space<vmem>>, vector<16x128xbf16>,
    return
  }
}

</mosaic_0001>

<bundles_post_ra>
// kernel: clip_text_tower_forward.1
= control target key start
LH: loop header
LB: loop body
LE: loop exit
PB: predicated region body
PF: predicated region fallthrough
CT: control target
= control target key end

     0   :  { %s3643_s0 = inlined_call_operand.vmem [shape: f32[16,128], index: 0, kind: input, shape index: {}]   ;;  %s3644_s1 = inlined_call_operand.vmem [shape: f32[2,8], index: 1, kind: input, shape index: {}]   ;;  %s3645_s2 = inlined_call_operand.vmem [shape: f32[2,1,128], index: 2, kind: input, shape index: {}]   ;;  %s3646_s3 = inlined_call_operand.vmem [shape: f32[2,1,128], index: 3, kind: input, shape index: {}]   ;;  %s3647_s4 = inlined_call_operand.hbm [shape: bf16[2,128,384], index: 4, kind: input, shape index: {}]   ;;  %s3648_s5 = inlined_call_operand.vmem [shape: f32[2,1,384], index: 5, kind: input, shape index: {}]   ;;  %s3649_s6 = inlined_call_operand.vmem [shape: bf16[2,128,128], index: 6, kind: input, shape index: {}]   ;;  %s3650_s7 = inlined_call_operand.vmem [shape: f32[2,1,128], index: 7, kind: input, shape index: {}]   ;;  %s3651_s8 = inlined_call_operand.vmem [shape: f32[2,1,128], index: 8, kind: input, shape index: {}]   ;;  %s3652_s9 = inlined_call_operand.vmem [shape: f32[2,1,128], index: 9, kind: input, shape index: {}]   ;;  %s3653_s10 = inlined_call_operand.hbm [shape: bf16[2,128,256], index: 10, kind: input, shape index: {}]   ;;  %s3654_s11 = inlined_call_operand.vmem [shape: f32[2,1,256], index: 11, kind: input, shape index: {}]   ;;  %s3655_s12 = inlined_call_operand.hbm [shape: bf16[2,256,128], index: 12, kind: input, shape index: {}]   ;;  %s3656_s13 = inlined_call_operand.vmem [shape: f32[2,1,128], index: 13, kind: input, shape index: {}]   ;;  %s3657_s14 = inlined_call_operand.vmem [shape: f32[1,128], index: 14, kind: input, shape index: {}]   ;;  %s3658_s15 = inlined_call_operand.vmem [shape: f32[1,128], index: 15, kind: input, shape index: {}]   ;;  %s3659_s16 = inlined_call_operand.vmem [shape: bf16[16,128], index: 16, kind: output, shape index: {}]  }
   0x1   :  { %3661 = sst [smem:[#allocation9_spill]] %s3643_s0 }
   0x2   :  { %21 = vsyncpa [#allocation3], 0 }
   0x3   :  { %22 = vsyncpa [#allocation5], 0  ;;  %s58_s23 = sshll.u32 %s3653_s10, 4  ;;  %s3169_s24 = smov [#allocation4]   ;;  %s59_s23 = int_to_ptr.hbm [resolvable:$true] %s58_s23 }
   0x4   :  { %s60_s25 = sshll.u32 %s3169_s24, 4  ;;  %s35_s28 = sshll.u32 %s3647_s4, 4  ;;  %s61_s25 = int_to_ptr.vmem [resolvable:$true] %s60_s25  ;;  %s36_s28 = int_to_ptr.hbm [resolvable:$true] %s35_s28 }
   0x5   :  { %s3170_s29 = smov 128   ;;  %s3171_s30 = smov 8  }
   0x6   :  { %66 = dma.hbm_to_vmem [thread:$0]  %s59_s23, 4096, %s61_s25, [#allocation5], %s3170_s29, %s3170_s29, %s3171_s30  }
   0x7   :  { %s3172_s0 = smov [#allocation2]   ;;  %s3173_s18 = smov 192  }
   0x8   :  { %s37_s17 = sshll.u32 %s3172_s0, 4  ;;  %s3174_s19 = smov 12   ;;  %s38_s17 = int_to_ptr.vmem [resolvable:$true] %s37_s17 }
   0x9   :  { %43 = dma.hbm_to_vmem [thread:$0]  %s36_s28, 6144, %s38_s17, [#allocation3], %s3173_s18, %s3173_s18, %s3174_s19  }
   0xa   :  { %s73_s21 = sshll.u32 %s3655_s12, 4  ;;  %s3175_s22 = smov [#allocation6]   ;;  %s74_s21 = int_to_ptr.hbm [resolvable:$true] %s73_s21 }
   0xb   :  { %s75_s24 = sshll.u32 %s3175_s22, 4  ;;  %s3176_s26 = smov 64   ;;  %s76_s24 = int_to_ptr.vmem [resolvable:$true] %s75_s24 }
   0xc   :  { %s3177_s4 = smov 4  }
   0xd   :  { %81 = dma.hbm_to_vmem [thread:$0]  %s74_s21, 4096, %s76_s24, [#allocation5], %s3176_s26, %s3176_s26, %s3177_s4  }
   0xe   :  { %3165 = dma.done.wait [#allocation3], 6144  }
   0xf   :  { %3166 = vsyncadd [#allocation3], 4294961152 }
  0x10   :  { %3167 = dma.done.wait [#allocation5], 8192  }
  0x11   :  { %3168 = vsyncadd [#allocation5], 4294959104  ;;  %s3662_s27 = sld [smem:[#allocation9_spill]]  ;;  %v3178_v2 = vmov 128.0   ;;  %v2370_v17 = vld [vmem:[#allocation2 + $0xa8] sm:$0xf] }
  0x12   :  { %3007 = vrcp.f32 %v3178_v2  ;;  %v2870_v18 = vld [vmem:[#allocation2 + $0xb0] sm:$0xf0]  ;;  %v2869_v19 = vld [vmem:[#allocation2 + $0xac] sm:$0xf]  ;;  %v2372_v21 = vld [vmem:[#allocation2 + $0xb4] sm:$0xf0] }
  0x13   :  { %v2371_v20 = vor.u32 %v2870_v18, %v2370_v17  ;;  %v2378_v22 = vld [vmem:[#allocation2 + $0xb0] sm:$0xf]  ;;  %v2871_v23 = vld [vmem:[#allocation2 + $0xb8] sm:$0xf0]  ;;  %v2375_v24 = vor.u32 %v2869_v19, %v2372_v21  ;;  %v2866_v28 = vld [vmem:[#allocation2 + $0x94] sm:$0xf] }
  0x14   :  { %v2379_v25 = vor.u32 %v2871_v23, %v2378_v22  ;;  %v2358_v26 = vld [vmem:[#allocation2 + $0x90] sm:$0xf]  ;;  %v2867_v27 = vld [vmem:[#allocation2 + $0x98] sm:$0xf0]  ;;  %v2360_v30 = vld [vmem:[#allocation2 + $0x9c] sm:$0xf0] }
  0x15   :  { %352 = vmatpush.bf16.msra.mxu0 %v2371_v20  ;;  %366 = vmatpush.bf16.msra.mxu1 %v2375_v24  ;;  %v2359_v29 = vor.u32 %v2867_v27, %v2358_v26  ;;  %v2366_v31 = vld [vmem:[#allocation2 + $0x98] sm:$0xf]  ;;  %v2868_v32 = vld [vmem:[#allocation2 + $0xa0] sm:$0xf0]  ;;  %v2363_v33 = vor.u32 %v2866_v28, %v2360_v30  ;;  %v2863_v37 = vld [vmem:[#allocation2 + $0x7c] sm:$0xf] }
  0x16   :  { %380 = vmatpush.bf16.msra.mxu2 %v2379_v25  ;;  %v2367_v34 = vor.u32 %v2868_v32, %v2366_v31  ;;  %v2346_v35 = vld [vmem:[#allocation2 + $0x78] sm:$0xf]  ;;  %v2864_v36 = vld [vmem:[#allocation2 + $0x80] sm:$0xf0]  ;;  %v2348_v39 = vld [vmem:[#allocation2 + $0x84] sm:$0xf0] }
  0x17   :  { %v3280_v0 = vld [vmem:[%s3662_s27] sm:$0xff]  ;;  %v3286_v1 = vld [vmem:[%s3662_s27 + $0x8] sm:$0xff]  ;;  %v2347_v38 = vor.u32 %v2864_v36, %v2346_v35  ;;  %v2351_v42 = vor.u32 %v2863_v37, %v2348_v39  ;;  %v2336_v48 = vld [vmem:[#allocation2 + $0x6c] sm:$0xf0]  ;;  %vm414_vm7 = vcmask 523264   ;;  %vm483_vm8 = vcmask 1043456  }
  0x18   :  { %126 = vadd.xlane.f32.xlu0 %v3280_v0  ;;  %v3008_v3 = vpop.eup %3007  ;;  %v2354_v40 = vld [vmem:[#allocation2 + $0x80] sm:$0xf]  ;;  %v2865_v41 = vld [vmem:[#allocation2 + $0x88] sm:$0xf0]  ;;  %v2860_v46 = vld [vmem:[#allocation2 + $0x64] sm:$0xf] }
  0x19   :  { %v131_v4 = vmul.f32 128.0, %v3008_v3  ;;  %vm135_vm0 = vweird.f32 %v3008_v3  ;;  %353 = vmatpush.bf16.msra.mxu0 %v2359_v29  ;;  %367 = vmatpush.bf16.msra.mxu1 %v2363_v33  ;;  %v2355_v43 = vor.u32 %v2865_v41, %v2354_v40  ;;  %v2334_v44 = vld [vmem:[#allocation2 + $0x60] sm:$0xf]  ;;  %v2861_v45 = vld [vmem:[#allocation2 + $0x68] sm:$0xf0]  ;;  %v2339_v51 = vor.u32 %v2860_v46, %v2336_v48 }
  0x1a   :  { %381 = vmatpush.bf16.msra.mxu2 %v2367_v34  ;;  %v2335_v47 = vor.u32 %v2861_v45, %v2334_v44  ;;  %v2342_v49 = vld [vmem:[#allocation2 + $0x68] sm:$0xf]  ;;  %v2862_v50 = vld [vmem:[#allocation2 + $0x70] sm:$0xf0]  ;;  %v2857_v55 = vld [vmem:[#allocation2 + $0x4c] sm:$0xf] }
  0x1b   :  { %v132_v5 = vsub.f32 1.0, %v131_v4  ;;  %v2343_v52 = vor.u32 %v2862_v50, %v2342_v49  ;;  %v2322_v53 = vld [vmem:[#allocation2 + $0x48] sm:$0xf]  ;;  %v2858_v54 = vld [vmem:[#allocation2 + $0x50] sm:$0xf0]  ;;  %vm453_vm14 = vcmask 64512  }
  0x1c   :  { %v2323_v56 = vor.u32 %v2858_v54, %v2322_v53  ;;  %v2324_v57 = vld [vmem:[#allocation2 + $0x54] sm:$0xf0]  ;;  %v2330_v58 = vld [vmem:[#allocation2 + $0x50] sm:$0xf]  ;;  %v2859_v59 = vld [vmem:[#allocation2 + $0x58] sm:$0xf0] }
  0x1d   :  { %v133_v6 = vmul.f32 %v3008_v3, %v132_v5  ;;  %354 = vmatpush.bf16.msra.mxu0 %v2347_v38  ;;  %368 = vmatpush.bf16.msra.mxu1 %v2351_v42  ;;  %v2327_v60 = vor.u32 %v2857_v55, %v2324_v57  ;;  %v2331_v61 = vor.u32 %v2859_v59, %v2330_v58  ;;  %v2310_v62 = vld [vmem:[#allocation2 + $0x30] sm:$0xf]  ;;  %v2855_v63 = vld [vmem:[#allocation2 + $0x38] sm:$0xf0]  ;;  %v2854_v2 = vld [vmem:[#allocation2 + $0x34] sm:$0xf] }
  0x1e   :  { %382 = vmatpush.bf16.msra.mxu2 %v2355_v43  ;;  %v2312_v4 = vld [vmem:[#allocation2 + $0x3c] sm:$0xf0]  ;;  %v2318_v5 = vld [vmem:[#allocation2 + $0x38] sm:$0xf]  ;;  %v2853_v18 = vld [vmem:[#allocation2 + $0x28] sm:$0xf0] }
  0x1f   :  { %v134_v7 = vadd.f32 %v3008_v3, %v133_v6  ;;  %v2856_v6 = vld [vmem:[#allocation2 + $0x40] sm:$0xf0]  ;;  %v2306_v17 = vld [vmem:[#allocation2 + $0x20] sm:$0xf]  ;;  %v2849_v22 = vld [vmem:[#allocation2 + $0x8] sm:$0xf0] }
  0x20   :  { %128 = vadd.xlane.f32.xlu0 %v3286_v1  ;;  %v2307_v20 = vor.u32 %v2853_v18, %v2306_v17  ;;  %v2286_v21 = vld [vmem:[#allocation2] sm:$0xf]  ;;  %v2848_v23 = vld [vmem:[#allocation2 + $0x4] sm:$0xf]  ;;  %v2288_v26 = vld [vmem:[#allocation2 + $0xc] sm:$0xf0] }
  0x21   :  { %v3289_v8 = vsel %vm135_vm0, %v3008_v3, %v134_v7  ;;  %355 = vmatpush.bf16.msra.mxu0 %v2335_v47  ;;  %369 = vmatpush.bf16.msra.mxu1 %v2339_v51  ;;  %v2311_v3 = vor.u32 %v2855_v63, %v2310_v62  ;;  %v2315_v7 = vor.u32 %v2854_v2, %v2312_v4  ;;  %v2294_v27 = vld [vmem:[#allocation2 + $0x8] sm:$0xf]  ;;  %v2850_v28 = vld [vmem:[#allocation2 + $0x10] sm:$0xf0]  ;;  %v2993_v49 = vld [vmem:[%s3645_s2] ss:$0 sm:$0xff] }
  0x22   :  { %383 = vmatpush.bf16.msra.mxu2 %v2343_v52  ;;  %v2287_v25 = vor.u32 %v2849_v22, %v2286_v21  ;;  %v2291_v30 = vor.u32 %v2848_v23, %v2288_v26  ;;  %v2295_v31 = vor.u32 %v2850_v28, %v2294_v27  ;;  %v2994_v54 = vld [vmem:[%s3646_s3] ss:$0 sm:$0xff] }
  0x25   :  { %356 = vmatpush.bf16.msra.mxu0 %v2323_v56  ;;  %370 = vmatpush.bf16.msra.mxu1 %v2327_v60 }
  0x26   :  { %384 = vmatpush.bf16.msra.mxu2 %v2331_v61 }
  0x29   :  { %357 = vmatpush.bf16.msra.mxu0 %v2311_v3  ;;  %371 = vmatpush.bf16.msra.mxu1 %v2315_v7 }
  0x8b   :  { %v127_v9 = vpop.xlane.xlu0 %126 }
  0x8c   :  { %v137_v10 = vmul.f32 %v3289_v8, %v127_v9  ;;  %v2319_v9 = vor.u32 %v2856_v6, %v2318_v5 }
  0x8e   :  { %v3293_v11 = vsub.f32 %v3280_v0, %v137_v10  ;;  %385 = vmatpush.bf16.msra.mxu2 %v2319_v9  ;;  %v2298_v10 = vld [vmem:[#allocation2 + $0x18] sm:$0xf] }
  0x90   :  { %v141_v12 = vmul.f32 %v3293_v11, %v3293_v11 }
  0x92   :  { %143 = vadd.xlane.f32.xlu1 %v141_v12  ;;  %v2852_v12 = vld [vmem:[#allocation2 + $0x20] sm:$0xf0]  ;;  %386 = vmatpush.bf16.msra.mxu2 %v2307_v20 }
  0x93   :  { %v129_v13 = vpop.xlane.xlu0 %128 }
  0x94   :  { %v138_v14 = vmul.f32 %v3289_v8, %v129_v13  ;;  %v2851_v13 = vld [vmem:[#allocation2 + $0x1c] sm:$0xf] }
  0x96   :  { %v3299_v15 = vsub.f32 %v3286_v1, %v138_v14  ;;  %v2299_v14 = vor.u32 %v2852_v12, %v2298_v10  ;;  %387 = vmatpush.bf16.msra.mxu2 %v2295_v31 }
  0x98   :  { %v142_v16 = vmul.f32 %v3299_v15, %v3299_v15  ;;  %358 = vmatpush.bf16.msra.mxu0 %v2299_v14 }
  0x9a   :  { %145 = vadd.xlane.f32.xlu1 %v142_v16  ;;  %v2300_v16 = vld [vmem:[#allocation2 + $0x24] sm:$0xf0] }
  0x9b   :  { %v2303_v19 = vor.u32 %v2851_v13, %v2300_v16 }
  0x9c   :  { %359 = vmatpush.bf16.msra.mxu0 %v2287_v25 }
  0x9d   :  { %372 = vmatpush.bf16.msra.mxu1 %v2303_v19 }
  0xa1   :  { %373 = vmatpush.bf16.msra.mxu1 %v2291_v30 }
 0x105   :  { %v144_v24 = vpop.xlane.xlu1 %143 }
 0x106   :  { %v147_v29 = vmul.f32 %v144_v24, %v3289_v8 }
 0x108   :  { %v149_v32 = vadd.f32 1e-05, %v147_v29 }
 0x10a   :  { %3009 = vrsqrt.f32 %v149_v32  ;;  %vm157_vm2 = vweird.f32 %v149_v32 }
 0x10d   :  { %v146_v33 = vpop.xlane.xlu1 %145 }
 0x10e   :  { %v148_v34 = vmul.f32 %v146_v33, %v3289_v8 }
 0x110   :  { %v3010_v35 = vpop.eup %3009  ;;  %v150_v36 = vadd.f32 1e-05, %v148_v34 }
 0x111   :  { %v152_v37 = vmul.f32 %v3010_v35, %v149_v32  ;;  %vm158_vm1 = vweird.f32 %v3010_v35 }
 0x112   :  { %3011 = vrsqrt.f32 %v150_v36  ;;  %vm159_vm3 = vmor %vm157_vm2, %vm158_vm1  ;;  %vm167_vm5 = vweird.f32 %v150_v36 }
 0x113   :  { %v153_v38 = vmul.f32 %v3010_v35, %v152_v37  ;;  %v106_v37 = vld [vmem:[%s3644_s1] sm:$0x3] }
 0x114   :  { %vm107_vm9 = vcmp.gt.f32.partialorder %v106_v37, 0.5 }
 0x115   :  { %v154_v39 = vmul.f32 0.5, %v153_v38  ;;  %v101_v38 = vlaneseq }
 0x117   :  { %v155_v40 = vsub.f32 1.5, %v154_v39  ;;  %v3179_v39 = vmov 0  }
 0x118   :  { %v3012_v41 = vpop.eup %3011 }
 0x119   :  { %v156_v42 = vmul.f32 %v3010_v35, %v155_v40  ;;  %v162_v43 = vmul.f32 %v3012_v41, %v150_v36  ;;  %vm168_vm4 = vweird.f32 %v3012_v41  ;;  %v108_v40 = vsel %vm107_vm9, 1, %v3179_v39 }
 0x11a   :  { %vm169_vm6 = vmor %vm167_vm5, %vm168_vm4 }
 0x11b   :  { %v163_v44 = vmul.f32 %v3012_v41, %v162_v43  ;;  %v160_v45 = vsel %vm159_vm3, %v3010_v35, %v156_v42  ;;  %v102_v42 = vshrl.u32 %v101_v38, 7  ;;  %v104_v43 = vand.u32 127, %v101_v38 }
 0x11c   :  { %v171_v48 = vmul.f32 %v160_v45, %v3293_v11  ;;  %v216_v11 = vld [vmem:[%s3648_s5] sm:$0x7]  ;;  %v109_v45 = vrot.slane %v108_v40, 1 }
 0x11d   :  { %v164_v46 = vmul.f32 0.5, %v163_v44  ;;  %v218_v59 = vperm.slane %v216_v11, 0  ;;  %v219_v60 = vperm.slane %v216_v11, 1  ;;  %v220_v4 = vperm.slane %v216_v11, 2 }
 0x11e   :  { %v176_v53 = vmul.f32 %v2993_v49, %v171_v48  ;;  %v114_v44 = vperm.slane %v108_v40, 0  ;;  %vm105_vm10 = vcmp.ge.s32.totalorder %v102_v42, %v104_v43  ;;  %vm110_vm13 = vcmp.ne.s32.totalorder %v109_v45, 0  ;;  %v2874_v42 = vld [vmem:[%s3649_s6 + $0x10] sm:$0xff]  ;;  %v2873_v45 = vld [vmem:[%s3649_s6 + $0x8] sm:$0xff] }
 0x11f   :  { %v165_v47 = vsub.f32 1.5, %v164_v46  ;;  %v3180_v46 = vmov -1e+09  }
 0x120   :  { %v181_v56 = vadd.f32 %v2994_v54, %v176_v53  ;;  %vm116_vm11 = vcmp.eq.s32.totalorder %v114_v44, 1 }
 0x121   :  { %v166_v50 = vmul.f32 %v3012_v41, %v165_v47  ;;  %vm118_vm12 = vmand %vm105_vm10, %vm116_vm11 }
 0x122   :  { %v3340_v47 = vsel %vm118_vm12, 0.0, %v3180_v46 }
 0x123   :  { %v170_v51 = vsel %vm169_vm6, %v3012_v41, %v166_v50  ;;  %v113_v50 = vsel %vm110_vm13, 1, %v3179_v39 }
 0x124   :  { %v172_v52 = vmul.f32 %v170_v51, %v3299_v15 }
 0x126   :  { %v177_v55 = vmul.f32 %v2993_v49, %v172_v52  ;;  %v115_v52 = vperm.slane %v113_v50, 0 }
 0x128   :  { %v182_v57 = vadd.f32 %v2994_v54, %v177_v55  ;;  %vm117_vm15 = vcmp.eq.s32.totalorder %v115_v52, 1 }
 0x129   :  { %vm119_vm0 = vmand %vm105_vm10, %vm117_vm15 }
 0x12a   :  { %v183_v58 = vpack.c.bf16 %v182_v57, %v181_v56  ;;  %v3345_v54 = vsel %vm119_vm0, 0.0, %v3180_v46 }
 0x12c   :  { %360 = vmatmul.bf16.vlgmr.msra.gmra.mxu0 %v183_v58  ;;  %374 = vmatmul.bf16.vlgmr.msra.gmra.mxu1 %v183_v58 }
 0x12d   :  { %388 = vmatmul.bf16.vlgmr.msra.gmra.mxu2 %v183_v58 }
 0x1a9   :  { %v361_v61 = vpop.f32.mrf.mxu0  ;;  %v375_v15 = vpop.f32.mrf.mxu1 }
 0x1aa   :  { %v362_v62 = vadd.f32 %v361_v61, %v218_v59  ;;  %v376_v63 = vadd.f32 %v375_v15, %v219_v60 }
 0x1ac   :  { %v410_v2 = vpack.c.bf16 %v362_v62, %v362_v62  ;;  %v412_v3 = vpack.c.bf16 %v376_v63, %v376_v63 }
 0x1ae   :  { %v419_v5 = vsel %vm414_vm7, %v412_v3, 0  ;;  %v526_v6 = vunpack.c.l.b16 %v412_v3  ;;  %v521_v7 = vunpack.c.l.b16 %v410_v2 }
 0x1af   :  { %428 = vmatpush.bf16.xpose.msra.mxu3 %v419_v5 }
 0x1b0   :  { %v389_v9 = vpop.f32.mrf.mxu2  ;;  %v527_v10 = vpack.c.b16 %v526_v6, %v526_v6  ;;  %v522_v12 = vpack.c.b16 %v521_v7, %v521_v7 }
 0x1b1   :  { %v390_v13 = vadd.f32 %v389_v9, %v220_v4  ;;  %v363_v14 = vpop.f32.mrf.mxu0  ;;  %v377_v16 = vpop.f32.mrf.mxu1 }
 0x1b2   :  { %v364_v17 = vadd.f32 %v363_v14, %v218_v59  ;;  %v378_v18 = vadd.f32 %v377_v16, %v219_v60  ;;  %528 = vrot.lane.b32.xlu2 %v527_v10, %s3176_s26  ;;  %523 = vrot.lane.b32.xlu0 %v522_v12, %s3176_s26 }
 0x1b3   :  { %v3319_v19 = vpack.c.bf16 %v390_v13, %v390_v13 }
 0x1b4   :  { %v411_v20 = vpack.c.bf16 %v364_v17, %v364_v17  ;;  %v413_v21 = vpack.c.bf16 %v378_v18, %v378_v18 }
 0x1b5   :  { %v485_v25 = vsel %vm483_vm8, %v3319_v19, 0  ;;  %v603_v6 = vunpack.c.l.b16 %v3319_v19 }
 0x1b6   :  { %2380 = vmatmul.msk.bf16.vlgmr.msra.gmra.mxu3 %vm414_vm7, %v410_v2  ;;  %v438_v22 = vsel %vm414_vm7, %v413_v21, 0  ;;  %v555_v23 = vunpack.c.l.b16 %v413_v21  ;;  %v550_v24 = vunpack.c.l.b16 %v411_v20 }
 0x1b7   :  { %447 = vmatpush.bf16.xpose.msrb.mxu3 %v438_v22  ;;  %v604_v10 = vpack.c.b16 %v603_v6, %v603_v6 }
 0x1b8   :  { %v391_v26 = vpop.f32.mrf.mxu2  ;;  %v556_v27 = vpack.c.b16 %v555_v23, %v555_v23  ;;  %v551_v28 = vpack.c.b16 %v550_v24, %v550_v24 }
 0x1b9   :  { %v392_v29 = vadd.f32 %v391_v26, %v220_v4 }
 0x1ba   :  { %557 = vrot.lane.b32.xlu2 %v556_v27, %s3176_s26  ;;  %552 = vrot.lane.b32.xlu1 %v551_v28, %s3176_s26 }
 0x1bb   :  { %v3327_v30 = vpack.c.bf16 %v392_v29, %v392_v29 }
 0x1bd   :  { %v504_v31 = vsel %vm483_vm8, %v3327_v30, 0 }
 0x1be   :  { %513 = vmatpush.bf16.msrb.mxu0 %v504_v31 }
 0x1bf   :  { %494 = vmatpush.bf16.msra.mxu3 %v485_v25 }
 0x1c6   :  { %2381 = vmatmul.msk.bf16.vlgmr.msrb.gmra.mxu3 %vm414_vm7, %v411_v20 }
 0x20c   :  { %v529_v32 = vpop.permute.xlu2 %528 }
 0x20d   :  { %v534_v33 = vsel %vm414_vm7, %v529_v32, 0  ;;  %v627_v32 = vunpack.c.l.b16 %v3327_v30 }
 0x20e   :  { %543 = vmatpush.bf16.xpose.msrb.mxu1 %v534_v33 }
 0x214   :  { %v558_v34 = vpop.permute.xlu2 %557 }
 0x215   :  { %v563_v35 = vsel %vm414_vm7, %v558_v34, 0 }
 0x216   :  { %572 = vmatpush.bf16.xpose.msrb.mxu2 %v563_v35  ;;  %v628_v35 = vpack.c.b16 %v627_v32, %v627_v32 }
 0x224   :  { %v524_v36 = vpop.permute.xlu0 %523 }
 0x225   :  { %2384 = vmatmul.msk.bf16.vlgmr.msrb.gmra.mxu1 %vm414_vm7, %v524_v36 }
 0x22c   :  { %v553_v41 = vpop.permute.xlu1 %552 }
 0x22d   :  { %2385 = vmatmul.msk.bf16.vlgmr.msrb.gmra.mxu2 %vm414_vm7, %v553_v41  ;;  %v2875_v41 = vld [vmem:[%s3649_s6 + $0x18] sm:$0xff] }
 0x22e   :  { %723 = vmatpush.bf16.msra.mxu2 %v2875_v41  ;;  %v2890_v41 = vld [vmem:[#allocation4 + $0x54] sm:$0xf] }
 0x232   :  { %724 = vmatpush.bf16.msra.mxu2 %v2874_v42  ;;  %v2466_v42 = vld [vmem:[#allocation4 + $0x58] sm:$0xf0] }
 0x236   :  { %725 = vmatpush.bf16.msra.mxu2 %v2873_v45  ;;  %v2889_v45 = vld [vmem:[#allocation4 + $0x44] sm:$0xf0] }
 0x239   :  { %v430_v48 = vpop.f32.mrf.mxu3 }
 0x23a   :  { %v431_v49 = vadd.f32 %v430_v48, %v3340_v47 }
 0x23c   :  { %v454_v51 = vsel %vm453_vm14, %v431_v49, -inf }
 0x23d   :  { %455 = vmax.xlane.f32.xlu2 %v454_v51 }
 0x241   :  { %v432_v53 = vpop.f32.mrf.mxu3 }
 0x249   :  { %v449_v55 = vpop.f32.mrf.mxu3 }
 0x24a   :  { %v450_v56 = vadd.f32 %v449_v55, %v3345_v54 }
 0x24c   :  { %v457_v57 = vsel %vm453_vm14, %v450_v56, -inf }
 0x24d   :  { %458 = vmax.xlane.f32.xlu0 %v457_v57 }
 0x251   :  { %v451_v58 = vpop.f32.mrf.mxu3 }
 0x2a2   :  { %v545_v11 = vpop.f32.mrf.mxu1 }
 0x2a3   :  { %v546_v59 = vadd.f32 %v545_v11, %v3340_v47 }
 0x2a5   :  { %v578_v60 = vsel %vm453_vm14, %v546_v59, -inf }
 0x2a6   :  { %579 = vmax.xlane.f32.xlu1 %v578_v60 }
 0x2aa   :  { %v547_v61 = vpop.f32.mrf.mxu1 }
 0x2ab   :  { %v2878_v61 = vld [vmem:[%s3649_s6 + $0x30] sm:$0xff] }
 0x2b0   :  { %v574_v15 = vpop.f32.mrf.mxu2  ;;  %v456_v62 = vpop.xlane.xlu2 %455 }
 0x2b1   :  { %v575_v63 = vadd.f32 %v574_v15, %v3345_v54  ;;  %v460_v2 = vsub.f32 %v431_v49, %v456_v62  ;;  %v2872_v49 = vld [vmem:[%s3649_s6] sm:$0xff]  ;;  %v2877_v15 = vld [vmem:[%s3649_s6 + $0x28] sm:$0xff] }
 0x2b2   :  { %726 = vmatpush.bf16.msra.mxu2 %v2872_v49  ;;  %v2876_v62 = vld [vmem:[%s3649_s6 + $0x20] sm:$0xff]  ;;  %v2458_v49 = vld [vmem:[#allocation4 + $0x48] sm:$0xf0] }
 0x2b3   :  { %v462_v3 = vmul.f32 1.442695, %v460_v2  ;;  %v581_v4 = vsel %vm453_vm14, %v575_v63, -inf }
 0x2b4   :  { %582 = vmax.xlane.f32.xlu2 %v581_v4 }
 0x2b5   :  { %3013 = vpow2.f32 %v462_v3 }
 0x2b8   :  { %v576_v5 = vpop.f32.mrf.mxu2 }
 0x2bb   :  { %v3014_v7 = vpop.eup %3013 }
 0x2bc   :  { %v466_v9 = vsel %vm453_vm14, %v3014_v7, 0.0 }
 0x2bd   :  { %467 = vadd.xlane.f32.xlu2 %v466_v9 }
 0x2bf   :  { %605 = vrot.lane.b32.xlu1 %v604_v10, %s3176_s26  ;;  %v2995_v10 = vld [vmem:[%s3650_s7] ss:$0 sm:$0xff] }
 0x2c0   :  { %v459_v12 = vpop.xlane.xlu0 %458 }
 0x2c1   :  { %v461_v13 = vsub.f32 %v450_v56, %v459_v12  ;;  %v2879_v56 = vld [vmem:[%s3649_s6 + $0x38] sm:$0xff] }
 0x2c2   :  { %682 = vmatpush.bf16.msra.mxu1 %v2879_v56  ;;  %v2450_v56 = vld [vmem:[#allocation4 + $0x38] sm:$0xf0] }
 0x2c3   :  { %v464_v14 = vmul.f32 1.442695, %v461_v13 }
 0x2c5   :  { %3015 = vpow2.f32 %v464_v14 }
 0x2c6   :  { %683 = vmatpush.bf16.msra.mxu1 %v2878_v61  ;;  %v2442_v61 = vld [vmem:[#allocation4 + $0x28] sm:$0xf0] }
 0x2ca   :  { %684 = vmatpush.bf16.msra.mxu1 %v2877_v15 }
 0x2cb   :  { %v3016_v16 = vpop.eup %3015 }
 0x2cc   :  { %v469_v17 = vsel %vm453_vm14, %v3016_v16, 0.0 }
 0x2cd   :  { %470 = vadd.xlane.f32.xlu2 %v469_v17 }
 0x2ce   :  { %685 = vmatpush.bf16.msra.mxu1 %v2876_v62  ;;  %v2432_v62 = vld [vmem:[#allocation4 + $0x10] sm:$0xf] }
 0x319   :  { %v580_v18 = vpop.xlane.xlu1 %579 }
 0x31a   :  { %v584_v20 = vsub.f32 %v546_v59, %v580_v18 }
 0x31c   :  { %v586_v21 = vmul.f32 1.442695, %v584_v20 }
 0x31e   :  { %3017 = vpow2.f32 %v586_v21 }
 0x324   :  { %v3018_v19 = vpop.eup %3017 }
 0x325   :  { %v590_v22 = vsel %vm453_vm14, %v3018_v19, 0.0 }
 0x326   :  { %591 = vadd.xlane.f32.xlu0 %v590_v22 }
 0x327   :  { %v583_v23 = vpop.xlane.xlu2 %582 }
 0x328   :  { %v585_v24 = vsub.f32 %v575_v63, %v583_v23 }
 0x32a   :  { %v588_v25 = vmul.f32 1.442695, %v585_v24 }
 0x32c   :  { %3019 = vpow2.f32 %v588_v25 }
 0x330   :  { %v468_v26 = vpop.xlane.xlu2 %467 }
 0x331   :  { %3021 = vrcp.f32 %v468_v26  ;;  %v606_v27 = vpop.permute.xlu1 %605  ;;  %v2480_v26 = vld [vmem:[#allocation4 + $0x70] sm:$0xf] }
 0x332   :  { %v3020_v28 = vpop.eup %3019  ;;  %v611_v29 = vsel %vm483_vm8, %v606_v27, 0  ;;  %v2895_v27 = vld [vmem:[#allocation4 + $0x74] sm:$0xf0] }
 0x333   :  { %620 = vmatpush.bf16.msrb.mxu3 %v611_v29  ;;  %v593_v31 = vsel %vm453_vm14, %v3020_v28, 0.0  ;;  %v2481_v29 = vor.u32 %v2895_v27, %v2480_v26 }
 0x334   :  { %594 = vadd.xlane.f32.xlu2 %v593_v31  ;;  %v2482_v31 = vld [vmem:[#allocation4 + $0x78] sm:$0xf0] }
 0x337   :  { %v3022_v33 = vpop.eup %3021 }
 0x338   :  { %v474_v34 = vmul.f32 %v3022_v33, %v3014_v7  ;;  %v2472_v33 = vld [vmem:[#allocation4 + $0x60] sm:$0xf] }
 0x33a   :  { %v476_v36 = vpack.c.bf16 %v474_v34, %v474_v34  ;;  %629 = vrot.lane.b32.xlu0 %v628_v35, %s3176_s26  ;;  %v2893_v34 = vld [vmem:[#allocation4 + $0x64] sm:$0xf0]  ;;  %v2892_v35 = vld [vmem:[#allocation4 + $0x64] sm:$0xf] }
 0x33c   :  { %2382 = vmatmul.msk.bf16.vlgmr.msra.gmra.mxu3 %vm453_vm14, %v476_v36  ;;  %v2473_v36 = vor.u32 %v2893_v34, %v2472_v33 }
 0x33d   :  { %896 = vmatpush.bf16.msra.mxu3 %v2481_v29 }
 0x340   :  { %v471_v37 = vpop.xlane.xlu2 %470 }
 0x341   :  { %3023 = vrcp.f32 %v471_v37  ;;  %v2474_v37 = vld [vmem:[#allocation4 + $0x68] sm:$0xf0]  ;;  %897 = vmatpush.bf16.msra.mxu3 %v2473_v36 }
 0x347   :  { %v3024_v38 = vpop.eup %3023 }
 0x348   :  { %v475_v39 = vmul.f32 %v3024_v38, %v3016_v16  ;;  %v2477_v38 = vor.u32 %v2892_v35, %v2474_v37  ;;  %v2996_v37 = vld [vmem:[%s3651_s8] ss:$0 sm:$0xff] }
 0x34a   :  { %v477_v40 = vpack.c.bf16 %v475_v39, %v475_v39  ;;  %v2464_v39 = vld [vmem:[#allocation4 + $0x50] sm:$0xf] }
 0x34c   :  { %2383 = vmatmul.msk.bf16.vlgmr.msrb.gmra.mxu0 %vm453_vm14, %v477_v40  ;;  %v2891_v40 = vld [vmem:[#allocation4 + $0x54] sm:$0xf0] }
 0x399   :  { %v592_v30 = vpop.xlane.xlu0 %591 }
 0x39a   :  { %3025 = vrcp.f32 %v592_v30  ;;  %v2465_v30 = vor.u32 %v2891_v40, %v2464_v39 }
 0x39c   :  { %898 = vmatpush.bf16.msra.mxu3 %v2465_v30  ;;  %v2997_v30 = vld [vmem:[%s3652_s9] ss:$0 sm:$0xff] }
 0x3a0   :  { %v3026_v43 = vpop.eup %3025 }
 0x3a1   :  { %v598_v44 = vmul.f32 %v3026_v43, %v3018_v19  ;;  %v2469_v43 = vor.u32 %v2890_v41, %v2466_v42 }
 0x3a3   :  { %v600_v46 = vpack.c.bf16 %v598_v44, %v598_v44  ;;  %v2456_v44 = vld [vmem:[#allocation4 + $0x40] sm:$0xf] }
 0x3a5   :  { %2386 = vmatmul.msk.bf16.vlgmr.msrb.gmra.mxu3 %vm453_vm14, %v600_v46  ;;  %v2888_v46 = vld [vmem:[#allocation4 + $0x44] sm:$0xf] }
 0x3a7   :  { %v595_v48 = vpop.xlane.xlu2 %594 }
 0x3a8   :  { %3027 = vrcp.f32 %v595_v48  ;;  %v2457_v48 = vor.u32 %v2889_v45, %v2456_v44 }
 0x3aa   :  { %899 = vmatpush.bf16.msra.mxu3 %v2457_v48  ;;  %v2903_v48 = vld [vmem:[#allocation6 + $0x38] sm:$0xff] }
 0x3ab   :  { %1142 = vmatpush.bf16.msrb.mxu1 %v2903_v48 }
 0x3ac   :  { %v630_v50 = vpop.permute.xlu0 %629 }
 0x3ad   :  { %v635_v51 = vsel %vm483_vm8, %v630_v50, 0  ;;  %v2461_v50 = vor.u32 %v2888_v46, %v2458_v49  ;;  %v2910_v46 = vld [vmem:[#allocation6 + $0x70] sm:$0xff]  ;;  %v2909_v49 = vld [vmem:[#allocation6 + $0x68] sm:$0xff] }
 0x3ae   :  { %v3028_v52 = vpop.eup %3027  ;;  %644 = vmatpush.bf16.msra.mxu0 %v635_v51  ;;  %v2448_v51 = vld [vmem:[#allocation4 + $0x30] sm:$0xf] }
 0x3af   :  { %v599_v53 = vmul.f32 %v3028_v52, %v3020_v28  ;;  %v2894_v28 = vld [vmem:[#allocation4 + $0x74] sm:$0xf]  ;;  %v2887_v52 = vld [vmem:[#allocation4 + $0x34] sm:$0xf0] }
 0x3b0   :  { %v2485_v32 = vor.u32 %v2894_v28, %v2482_v31 }
 0x3b1   :  { %v601_v55 = vpack.c.bf16 %v599_v53, %v599_v53  ;;  %v2886_v53 = vld [vmem:[#allocation4 + $0x34] sm:$0xf] }
 0x3b2   :  { %910 = vmatpush.bf16.msrb.mxu0 %v2485_v32 }
 0x3b3   :  { %2387 = vmatmul.msk.bf16.vlgmr.msra.gmra.mxu0 %vm453_vm14, %v601_v55  ;;  %v2449_v55 = vor.u32 %v2887_v52, %v2448_v51  ;;  %v2908_v51 = vld [vmem:[#allocation6 + $0x60] sm:$0xff]  ;;  %v2901_v52 = vld [vmem:[#allocation6 + $0x28] sm:$0xff] }
 0x3b5   :  { %900 = vmatpush.bf16.msra.mxu3 %v2449_v55  ;;  %v2907_v55 = vld [vmem:[#allocation6 + $0x58] sm:$0xff] }
 0x3b6   :  { %911 = vmatpush.bf16.msrb.mxu0 %v2477_v38 }
 0x3ba   :  { %912 = vmatpush.bf16.msrb.mxu0 %v2469_v43 }
 0x3be   :  { %913 = vmatpush.bf16.msrb.mxu0 %v2461_v50  ;;  %v810_v50 = vld [vmem:[%s3654_s11] sm:$0x3] }
 0x3bf   :  { %v496_v57 = vpop.f32.mrf.mxu3 }
 0x3c7   :  { %v498_v58 = vpop.f32.mrf.mxu3 }
 0x3c8   :  { %v2440_v58 = vld [vmem:[#allocation4 + $0x20] sm:$0xf] }
 0x3c9   :  { %v515_v11 = vpop.f32.mrf.mxu0 }
 0x3ca   :  { %v519_v59 = vpack.c.bf16 %v515_v11, %v496_v57  ;;  %v2453_v57 = vor.u32 %v2886_v53, %v2450_v56  ;;  %v2885_v11 = vld [vmem:[#allocation4 + $0x24] sm:$0xf0]  ;;  %v813_v53 = vperm.slane %v810_v50, 1 }
 0x3cc   :  { %2421 = vmatmul.msk.bf16.vlgmr.msra.gmra.mxu2 %vm414_vm7, %v519_v59  ;;  %914 = vmatpush.bf16.msrb.mxu0 %v2453_v57  ;;  %v2884_v59 = vld [vmem:[#allocation4 + $0x24] sm:$0xf] }
 0x3cd   :  { %v2445_v15 = vor.u32 %v2884_v59, %v2442_v61  ;;  %v2900_v57 = vld [vmem:[#allocation6 + $0x20] sm:$0xff]  ;;  %v2899_v61 = vld [vmem:[#allocation6 + $0x18] sm:$0xff] }
 0x3d0   :  { %915 = vmatpush.bf16.msrb.mxu0 %v2445_v15 }
 0x3d1   :  { %v517_v60 = vpop.f32.mrf.mxu0 }
 0x3d2   :  { %v2441_v60 = vor.u32 %v2885_v11, %v2440_v58  ;;  %v2906_v11 = vld [vmem:[#allocation6 + $0x50] sm:$0xff] }
 0x3d4   :  { %901 = vmatpush.bf16.msra.mxu3 %v2441_v60  ;;  %v812_v60 = vperm.slane %v810_v50, 0 }
 0x428   :  { %v622_v63 = vpop.f32.mrf.mxu3 }
 0x430   :  { %v624_v2 = vpop.f32.mrf.mxu3  ;;  %v646_v3 = vpop.f32.mrf.mxu0 }
 0x431   :  { %v650_v4 = vpack.c.bf16 %v646_v3, %v622_v63  ;;  %v2883_v63 = vld [vmem:[#allocation4 + $0x14] sm:$0xf0]  ;;  %v2882_v2 = vld [vmem:[#allocation4 + $0x14] sm:$0xf] }
 0x432   :  { %v2433_v3 = vor.u32 %v2883_v63, %v2432_v62  ;;  %v2905_v63 = vld [vmem:[#allocation6 + $0x48] sm:$0xff] }
 0x433   :  { %2404 = vmatmul.msk.bf16.vlgmr.msra.gmra.mxu1 %vm414_vm7, %v650_v4  ;;  %v2434_v4 = vld [vmem:[#allocation4 + $0x18] sm:$0xf0] }
 0x434   :  { %902 = vmatpush.bf16.msra.mxu3 %v2433_v3 }
 0x438   :  { %v648_v5 = vpop.f32.mrf.mxu0 }
 0x439   :  { %v2424_v5 = vld [vmem:[#allocation4] sm:$0xf] }
 0x44f   :  { %v728_v6 = vpop.f32.mrf.mxu2 }
 0x457   :  { %v730_v14 = vpop.f32.mrf.mxu2 }
 0x4b0   :  { %v687_v7 = vpop.f32.mrf.mxu1 }
 0x4b1   :  { %v729_v9 = vadd.f32 %v728_v6, %v687_v7  ;;  %v2881_v6 = vld [vmem:[#allocation4 + $0x4] sm:$0xf0] }
 0x4b3   :  { %v733_v12 = vadd.f32 %v729_v9, %v3280_v0  ;;  %v2437_v9 = vor.u32 %v2882_v2, %v2434_v4  ;;  %v2898_v4 = vld [vmem:[#allocation6 + $0x10] sm:$0xff] }
 0x4b5   :  { %v3397_v13 = vadd.f32 %v2995_v10, %v733_v12  ;;  %v2426_v12 = vld [vmem:[#allocation4 + $0x8] sm:$0xf0]  ;;  %916 = vmatpush.bf16.msrb.mxu0 %v2437_v9 }
 0x4b7   :  { %743 = vadd.xlane.f32.xlu2 %v3397_v13 }
 0x4b8   :  { %v689_v16 = vpop.f32.mrf.mxu1 }
 0x4b9   :  { %v731_v17 = vadd.f32 %v730_v14, %v689_v16  ;;  %v2425_v16 = vor.u32 %v2881_v6, %v2424_v5 }
 0x4bb   :  { %v734_v18 = vadd.f32 %v731_v17, %v3286_v1  ;;  %903 = vmatpush.bf16.msra.mxu3 %v2425_v16 }
 0x4bd   :  { %v3401_v20 = vadd.f32 %v2995_v10, %v734_v18  ;;  %v2880_v10 = vld [vmem:[#allocation4 + $0x4] sm:$0xf] }
 0x4be   :  { %v2429_v17 = vor.u32 %v2880_v10, %v2426_v12  ;;  %v2897_v12 = vld [vmem:[#allocation6 + $0x8] sm:$0xff] }
 0x4bf   :  { %745 = vadd.xlane.f32.xlu2 %v3401_v20 }
 0x4c0   :  { %917 = vmatpush.bf16.msrb.mxu0 %v2429_v17 }
 0x52a   :  { %v744_v21 = vpop.xlane.xlu2 %743 }
 0x52b   :  { %v747_v19 = vmul.f32 %v744_v21, %v3289_v8 }
 0x52d   :  { %v3406_v22 = vsub.f32 %v3397_v13, %v747_v19 }
 0x52f   :  { %v751_v0 = vmul.f32 %v3406_v22, %v3406_v22 }
 0x531   :  { %753 = vadd.xlane.f32.xlu2 %v751_v0 }
 0x532   :  { %v746_v23 = vpop.xlane.xlu2 %745 }
 0x533   :  { %v748_v24 = vmul.f32 %v746_v23, %v3289_v8 }
 0x535   :  { %v3412_v25 = vsub.f32 %v3401_v20, %v748_v24 }
 0x537   :  { %v752_v1 = vmul.f32 %v3412_v25, %v3412_v25 }
 0x539   :  { %755 = vadd.xlane.f32.xlu0 %v752_v1 }
 0x5a4   :  { %v754_v7 = vpop.xlane.xlu2 %753 }
 0x5a5   :  { %v757_v14 = vmul.f32 %v754_v7, %v3289_v8  ;;  %v2904_v7 = vld [vmem:[#allocation6 + $0x40] sm:$0xff] }
 0x5a7   :  { %v759_v18 = vadd.f32 1e-05, %v757_v14 }
 0x5a9   :  { %3029 = vrsqrt.f32 %v759_v18  ;;  %vm767_vm2 = vweird.f32 %v759_v18 }
 0x5ac   :  { %v756_v21 = vpop.xlane.xlu0 %755 }
 0x5ad   :  { %v758_v19 = vmul.f32 %v756_v21, %v3289_v8 }
 0x5af   :  { %v3030_v0 = vpop.eup %3029  ;;  %v760_v23 = vadd.f32 1e-05, %v758_v19  ;;  %v2896_v19 = vld [vmem:[#allocation6] sm:$0xff] }
 0x5b0   :  { %v762_v24 = vmul.f32 %v3030_v0, %v759_v18  ;;  %vm768_vm1 = vweird.f32 %v3030_v0 }
 0x5b1   :  { %3031 = vrsqrt.f32 %v760_v23  ;;  %vm769_vm3 = vmor %vm767_vm2, %vm768_vm1  ;;  %vm777_vm5 = vweird.f32 %v760_v23 }
 0x5b2   :  { %v763_v1 = vmul.f32 %v3030_v0, %v762_v24 }
 0x5b4   :  { %v764_v26 = vmul.f32 0.5, %v763_v1 }
 0x5b6   :  { %v765_v27 = vsub.f32 1.5, %v764_v26 }
 0x5b7   :  { %v3032_v28 = vpop.eup %3031 }
 0x5b8   :  { %v766_v29 = vmul.f32 %v3030_v0, %v765_v27  ;;  %v772_v31 = vmul.f32 %v3032_v28, %v760_v23  ;;  %vm778_vm4 = vweird.f32 %v3032_v28 }
 0x5b9   :  { %vm779_vm6 = vmor %vm777_vm5, %vm778_vm4 }
 0x5ba   :  { %v773_v32 = vmul.f32 %v3032_v28, %v772_v31  ;;  %v770_v33 = vsel %vm769_vm3, %v3030_v0, %v766_v29 }
 0x5bb   :  { %v781_v36 = vmul.f32 %v770_v33, %v3406_v22  ;;  %v2911_v22 = vld [vmem:[#allocation6 + $0x78] sm:$0xff] }
 0x5bc   :  { %v774_v34 = vmul.f32 0.5, %v773_v32  ;;  %1156 = vmatpush.bf16.msrb.mxu2 %v2911_v22 }
 0x5bd   :  { %v786_v41 = vmul.f32 %v2996_v37, %v781_v36 }
 0x5be   :  { %v775_v35 = vsub.f32 1.5, %v774_v34 }
 0x5bf   :  { %v791_v43 = vadd.f32 %v2997_v30, %v786_v41 }
 0x5c0   :  { %v776_v38 = vmul.f32 %v3032_v28, %v775_v35  ;;  %1157 = vmatpush.bf16.msrb.mxu2 %v2910_v46 }
 0x5c2   :  { %v780_v39 = vsel %vm779_vm6, %v3032_v28, %v776_v38 }
 0x5c3   :  { %v782_v40 = vmul.f32 %v780_v39, %v3412_v25  ;;  %v2902_v25 = vld [vmem:[#allocation6 + $0x30] sm:$0xff] }
 0x5c4   :  { %1158 = vmatpush.bf16.msrb.mxu2 %v2909_v49  ;;  %1143 = vmatpush.bf16.msrb.mxu1 %v2902_v25 }
 0x5c5   :  { %v787_v42 = vmul.f32 %v2996_v37, %v782_v40 }
 0x5c7   :  { %v792_v44 = vadd.f32 %v2997_v30, %v787_v42 }
 0x5c8   :  { %1159 = vmatpush.bf16.msrb.mxu2 %v2908_v51  ;;  %1144 = vmatpush.bf16.msrb.mxu1 %v2901_v52 }
 0x5c9   :  { %v793_v45 = vpack.c.bf16 %v792_v44, %v791_v43 }
 0x5cb   :  { %904 = vmatmul.bf16.vlgmr.msra.gmra.mxu3 %v793_v45  ;;  %918 = vmatmul.bf16.vlgmr.msrb.gmra.mxu0 %v793_v45 }
 0x5cc   :  { %1160 = vmatpush.bf16.msrb.mxu2 %v2907_v55  ;;  %1145 = vmatpush.bf16.msrb.mxu1 %v2900_v57 }
 0x5d0   :  { %1161 = vmatpush.bf16.msrb.mxu2 %v2906_v11  ;;  %1146 = vmatpush.bf16.msrb.mxu1 %v2899_v61 }
 0x5d4   :  { %1162 = vmatpush.bf16.msrb.mxu2 %v2905_v63  ;;  %1147 = vmatpush.bf16.msrb.mxu1 %v2898_v4 }
 0x5d8   :  { %1163 = vmatpush.bf16.msrb.mxu2 %v2904_v7  ;;  %1148 = vmatpush.bf16.msrb.mxu1 %v2897_v12 }
 0x5dc   :  { %1149 = vmatpush.bf16.msrb.mxu1 %v2896_v19 }
 0x648   :  { %v919_v56 = vpop.f32.mrf.mxu0 }
 0x649   :  { %v3429_v58 = vadd.f32 %v919_v56, %v813_v53 }
 0x64b   :  { %v2487_v59 = vmul.f32 -1.702, %v3429_v58 }
 0x64d   :  { %v934_v15 = vmul.f32 1.442695, %v2487_v59  ;;  %v2627_v59 = vld [vmem:[#allocation2 + $0x140] sm:$0xf] }
 0x64e   :  { %v905_v62 = vpop.f32.mrf.mxu3 }
 0x64f   :  { %3033 = vpow2.f32 %v934_v15  ;;  %v3432_v2 = vadd.f32 %v905_v62, %v812_v60 }
 0x650   :  { %v921_v3 = vpop.f32.mrf.mxu0 }
 0x651   :  { %v2486_v5 = vmul.f32 -1.702, %v3432_v2  ;;  %v3435_v6 = vadd.f32 %v921_v3, %v813_v53 }
 0x653   :  { %v932_v9 = vmul.f32 1.442695, %v2486_v5  ;;  %v2489_v10 = vmul.f32 -1.702, %v3435_v6 }
 0x655   :  { %v3034_v14 = vpop.eup %3033  ;;  %3035 = vpow2.f32 %v932_v9  ;;  %v938_v16 = vmul.f32 1.442695, %v2489_v10 }
 0x656   :  { %v941_v17 = vadd.f32 1.0, %v3034_v14  ;;  %v907_v18 = vpop.f32.mrf.mxu3 }
 0x657   :  { %3037 = vpow2.f32 %v938_v16  ;;  %v3438_v21 = vadd.f32 %v907_v18, %v812_v60 }
 0x658   :  { %3039 = vrcp.f32 %v941_v17  ;;  %v968_v38 = vand.u32 2147483647, %v941_v17  ;;  %v970_v30 = vand.u32 2147483648, %v941_v17  ;;  %vm964_vm10 = vweird.f32 %v941_v17 }
 0x659   :  { %v2488_v0 = vmul.f32 -1.702, %v3438_v21 }
 0x65a   :  { %vm969_vm12 = vcmp.eq.f32.partialorder %v968_v38, 8.507059e+37  ;;  %v971_v25 = vor.u32 1.1754944e-38, %v970_v30  ;;  %v2934_v38 = vld [vmem:[#allocation2 + $0x170] sm:$0xf0]  ;;  %v2651_v30 = vld [vmem:[#allocation2 + $0x170] sm:$0xf] }
 0x65b   :  { %v3036_v23 = vpop.eup %3035  ;;  %v936_v24 = vmul.f32 1.442695, %v2488_v0 }
 0x65c   :  { %v940_v1 = vadd.f32 1.0, %v3036_v23 }
 0x65d   :  { %v3038_v26 = vpop.eup %3037  ;;  %3041 = vpow2.f32 %v936_v24 }
 0x65e   :  { %v3040_v27 = vpop.eup %3039  ;;  %3043 = vrcp.f32 %v940_v1  ;;  %v943_v29 = vadd.f32 1.0, %v3038_v26  ;;  %vm949_vm0 = vweird.f32 %v940_v1  ;;  %v955_v52 = vand.u32 2147483648, %v940_v1 }
 0x65f   :  { %v960_v28 = vmul.f32 %v3040_v27, %v941_v17  ;;  %vm965_vm9 = vweird.f32 %v3040_v27  ;;  %v953_v56 = vand.u32 2147483647, %v940_v1 }
 0x660   :  { %3045 = vrcp.f32 %v943_v29  ;;  %vm3441_vm11 = vmor %vm964_vm10, %vm965_vm9  ;;  %v1000_v45 = vand.u32 2147483648, %v943_v29  ;;  %v998_v49 = vand.u32 2147483647, %v943_v29  ;;  %vm994_vm1 = vweird.f32 %v943_v29 }
 0x661   :  { %v961_v31 = vsub.f32 1.0, %v960_v28  ;;  %v956_v5 = vor.u32 1.1754944e-38, %v955_v52  ;;  %vm954_vm6 = vcmp.eq.f32.partialorder %v953_v56, 8.507059e+37  ;;  %v2927_v56 = vld [vmem:[#allocation2 + $0x13c] sm:$0xf] }
 0x662   :  { %v1001_v57 = vor.u32 1.1754944e-38, %v1000_v45  ;;  %vm999_vm4 = vcmp.eq.f32.partialorder %v998_v49, 8.507059e+37  ;;  %v2631_v45 = vld [vmem:[#allocation2 + $0x150] sm:$0xf]  ;;  %v2633_v49 = vld [vmem:[#allocation2 + $0x15c] sm:$0xf0] }
 0x663   :  { %v3042_v32 = vpop.eup %3041  ;;  %v962_v34 = vmul.f32 %v3040_v27, %v961_v31 }
 0x664   :  { %v3044_v33 = vpop.eup %3043  ;;  %v942_v35 = vadd.f32 1.0, %v3042_v32 }
 0x665   :  { %v945_v36 = vmul.f32 %v3044_v33, %v940_v1  ;;  %v963_v40 = vadd.f32 %v3040_v27, %v962_v34  ;;  %vm950_vm15 = vweird.f32 %v3044_v33 }
 0x666   :  { %3047 = vrcp.f32 %v942_v35  ;;  %v3046_v37 = vpop.eup %3045  ;;  %vm3447_vm3 = vmor %vm949_vm0, %vm950_vm15  ;;  %v983_v61 = vand.u32 2147483647, %v942_v35  ;;  %v985_v15 = vand.u32 2147483648, %v942_v35  ;;  %vm979_vm9 = vweird.f32 %v942_v35 }
 0x667   :  { %v946_v39 = vsub.f32 1.0, %v945_v36  ;;  %v990_v41 = vmul.f32 %v3046_v37, %v943_v29  ;;  %v967_v46 = vsel %vm3441_vm11, %v3040_v27, %v963_v40  ;;  %vm995_vm13 = vweird.f32 %v3046_v37 }
 0x668   :  { %v972_v55 = vsel %vm969_vm12, %v971_v25, %v967_v46  ;;  %vm996_vm2 = vmor %vm994_vm1, %vm995_vm13  ;;  %v986_v14 = vor.u32 1.1754944e-38, %v985_v15  ;;  %vm984_vm11 = vcmp.eq.f32.partialorder %v983_v61, 8.507059e+37  ;;  %v2930_v46 = vld [vmem:[#allocation2 + $0x154] sm:$0xf]  ;;  %v2639_v25 = vld [vmem:[#allocation2 + $0x158] sm:$0xf] }
 0x669   :  { %v947_v42 = vmul.f32 %v3044_v33, %v946_v39  ;;  %v991_v43 = vsub.f32 1.0, %v990_v41  ;;  %v1005_v4 = vmul.f32 %v972_v55, %v3429_v58  ;;  %v2998_v58 = vld [vmem:[%s3656_s13] ss:$0 sm:$0xff]  ;;  %v2933_v39 = vld [vmem:[#allocation2 + $0x16c] sm:$0xf] }
 0x66a   :  { %v2645_v41 = vld [vmem:[#allocation2 + $0x174] sm:$0xf0]  ;;  %v2928_v55 = vld [vmem:[#allocation2 + $0x140] sm:$0xf0] }
 0x66b   :  { %v992_v48 = vmul.f32 %v3046_v37, %v991_v43  ;;  %v948_v50 = vadd.f32 %v3044_v33, %v947_v42  ;;  %v2935_v42 = vld [vmem:[#allocation2 + $0x178] sm:$0xf0]  ;;  %v2648_v43 = vor.u32 %v2933_v39, %v2645_v41  ;;  %v2573_v39 = vld [vmem:[#allocation2 + $0xe4] sm:$0xf0]  ;;  %v2917_v41 = vld [vmem:[#allocation2 + $0xe8] sm:$0xf0] }
 0x66c   :  { %v3048_v22 = vpop.eup %3047  ;;  %v2652_v44 = vor.u32 %v2935_v42, %v2651_v30 }
 0x66d   :  { %v975_v51 = vmul.f32 %v3048_v22, %v942_v35  ;;  %v993_v53 = vadd.f32 %v3046_v37, %v992_v48  ;;  %v952_v62 = vsel %vm3447_vm3, %v3044_v33, %v948_v50  ;;  %vm980_vm5 = vweird.f32 %v3048_v22  ;;  %1411 = vmatpush.bf16.msra.mxu0 %v2648_v43  ;;  %v2932_v50 = vld [vmem:[#allocation2 + $0x160] sm:$0xf0] }
 0x66e   :  { %v957_v10 = vsel %vm954_vm6, %v956_v5, %v952_v62  ;;  %vm981_vm10 = vmor %vm979_vm9, %vm980_vm5  ;;  %1425 = vmatpush.bf16.msra.mxu1 %v2652_v44  ;;  %v2640_v52 = vor.u32 %v2932_v50, %v2639_v25  ;;  %v2607_v62 = vld [vmem:[#allocation2 + $0x120] sm:$0xf]  ;;  %v2609_v5 = vld [vmem:[#allocation2 + $0x12c] sm:$0xf0] }
 0x66f   :  { %v976_v11 = vsub.f32 1.0, %v975_v51  ;;  %v997_v60 = vsel %vm996_vm2, %v3046_v37, %v993_v53  ;;  %v1004_v18 = vmul.f32 %v957_v10, %v3432_v2  ;;  %v2643_v37 = vld [vmem:[#allocation2 + $0x168] sm:$0xf]  ;;  %v2636_v51 = vor.u32 %v2930_v46, %v2633_v49  ;;  %v2619_v53 = vld [vmem:[#allocation2 + $0x138] sm:$0xf] }
 0x670   :  { %v1002_v63 = vsel %vm999_vm4, %v1001_v57, %v997_v60  ;;  %v2644_v40 = vor.u32 %v2934_v38, %v2643_v37  ;;  %v2620_v57 = vor.u32 %v2928_v55, %v2619_v53  ;;  %v2929_v60 = vld [vmem:[#allocation2 + $0x148] sm:$0xf0]  ;;  %v2559_v44 = vld [vmem:[#allocation2 + $0xc0] sm:$0xf]  ;;  %v2567_v49 = vld [vmem:[#allocation2 + $0xc8] sm:$0xf] }
 0x671   :  { %v977_v3 = vmul.f32 %v3048_v22, %v976_v11  ;;  %v1007_v7 = vmul.f32 %v1002_v63, %v3435_v6  ;;  %1412 = vmatpush.bf16.msra.mxu0 %v2636_v51  ;;  %v2621_v11 = vld [vmem:[#allocation2 + $0x144] sm:$0xf0]  ;;  %v2628_v15 = vor.u32 %v2929_v60, %v2627_v59  ;;  %v2925_v63 = vld [vmem:[#allocation2 + $0x128] sm:$0xf0]  ;;  %v2914_v25 = vld [vmem:[#allocation2 + $0xd0] sm:$0xf0] }
 0x672   :  { %1397 = vmatpush.bf16.msrb.mxu3 %v2644_v40  ;;  %1426 = vmatpush.bf16.msra.mxu1 %v2640_v52  ;;  %v2624_v61 = vor.u32 %v2927_v56, %v2621_v11  ;;  %v2579_v40 = vld [vmem:[#allocation2 + $0xe0] sm:$0xf]  ;;  %v2568_v52 = vor.u32 %v2914_v25, %v2567_v49 }
 0x673   :  { %v978_v9 = vadd.f32 %v3048_v22, %v977_v3  ;;  %v1009_v12 = vpack.c.bf16 %v1007_v7, %v1005_v4  ;;  %v2924_v3 = vld [vmem:[#allocation2 + $0x124] sm:$0xf]  ;;  %v2608_v4 = vor.u32 %v2925_v63, %v2607_v62  ;;  %v2615_v7 = vld [vmem:[#allocation2 + $0x128] sm:$0xf]  ;;  %v2580_v43 = vor.u32 %v2917_v41, %v2579_v40 }
 0x674   :  { %v2612_v10 = vor.u32 %v2924_v3, %v2609_v5 }
 0x675   :  { %v982_v16 = vsel %vm981_vm10, %v3048_v22, %v978_v9  ;;  %1164 = vmatmul.bf16.vlgmr.msrb.gmra.mxu2 %v1009_v12  ;;  %v2931_v22 = vld [vmem:[#allocation2 + $0x158] sm:$0xf0]  ;;  %1413 = vmatpush.bf16.msra.mxu0 %v2624_v61  ;;  %v2926_v9 = vld [vmem:[#allocation2 + $0x130] sm:$0xf0] }
 0x676   :  { %v987_v17 = vsel %vm984_vm11, %v986_v14, %v982_v16  ;;  %v2632_v48 = vor.u32 %v2931_v22, %v2631_v45  ;;  %1427 = vmatpush.bf16.msra.mxu1 %v2628_v15  ;;  %v2616_v12 = vor.u32 %v2926_v9, %v2615_v7  ;;  %v2595_v14 = vld [vmem:[#allocation2 + $0x108] sm:$0xf]  ;;  %v2922_v16 = vld [vmem:[#allocation2 + $0x110] sm:$0xf0]  ;;  %v2913_v45 = vld [vmem:[#allocation2 + $0xc8] sm:$0xf0] }
 0x677   :  { %v1006_v19 = vmul.f32 %v987_v17, %v3438_v21  ;;  %v2921_v17 = vld [vmem:[#allocation2 + $0x10c] sm:$0xf]  ;;  %v2912_v22 = vld [vmem:[#allocation2 + $0xc4] sm:$0xf]  ;;  %v2560_v46 = vor.u32 %v2913_v45, %v2559_v44 }
 0x678   :  { %1398 = vmatpush.bf16.msrb.mxu3 %v2632_v48  ;;  %v2561_v48 = vld [vmem:[#allocation2 + $0xcc] sm:$0xf0] }
 0x679   :  { %v1008_v0 = vpack.c.bf16 %v1006_v19, %v1004_v18  ;;  %1414 = vmatpush.bf16.msra.mxu0 %v2612_v10  ;;  %v2596_v18 = vor.u32 %v2922_v16, %v2595_v14  ;;  %v2597_v19 = vld [vmem:[#allocation2 + $0x114] sm:$0xf0]  ;;  %v2564_v51 = vor.u32 %v2912_v22, %v2561_v48  ;;  %v2999_v10 = vld [vmem:[%s3645_s2 + $0x1] ss:$0 sm:$0xff] }
 0x67a   :  { %1428 = vmatpush.bf16.msra.mxu1 %v2616_v12 }
 0x67b   :  { %1150 = vmatmul.bf16.vlgmr.msrb.gmra.mxu1 %v1008_v0  ;;  %v2603_v0 = vld [vmem:[#allocation2 + $0x110] sm:$0xf] }
 0x67c   :  { %1399 = vmatpush.bf16.msrb.mxu3 %v2620_v57 }
 0x680   :  { %1400 = vmatpush.bf16.msrb.mxu3 %v2608_v4 }
 0x684   :  { %1401 = vmatpush.bf16.msrb.mxu3 %v2596_v18  ;;  %v3000_v18 = vld [vmem:[%s3646_s3 + $0x1] ss:$0 sm:$0xff] }
 0x6f8   :  { %v1151_v6 = vpop.f32.mrf.mxu1  ;;  %v1165_v24 = vpop.f32.mrf.mxu2 }
 0x6f9   :  { %v1152_v23 = vadd.f32 %v2998_v58, %v1151_v6  ;;  %v2600_v6 = vor.u32 %v2921_v17, %v2597_v19 }
 0x6fb   :  { %v1166_v1 = vadd.f32 %v1165_v24, %v1152_v23  ;;  %1415 = vmatpush.bf16.msra.mxu0 %v2600_v6  ;;  %v2583_v24 = vld [vmem:[#allocation2 + $0xf0] sm:$0xf] }
 0x6fd   :  { %v3461_v26 = vadd.f32 %v1166_v1, %v3397_v13  ;;  %v2919_v1 = vld [vmem:[#allocation2 + $0xf8] sm:$0xf0] }
 0x6ff   :  { %1176 = vadd.xlane.f32.xlu1 %v3461_v26 }
 0x700   :  { %v1153_v27 = vpop.f32.mrf.mxu1  ;;  %v1167_v2 = vpop.f32.mrf.mxu2 }
 0x701   :  { %v1154_v28 = vadd.f32 %v2998_v58, %v1153_v27  ;;  %v2923_v58 = vld [vmem:[#allocation2 + $0x118] sm:$0xf0]  ;;  %v2918_v27 = vld [vmem:[#allocation2 + $0xf4] sm:$0xf] }
 0x702   :  { %v2604_v23 = vor.u32 %v2923_v58, %v2603_v0 }
 0x703   :  { %v1168_v29 = vadd.f32 %v1167_v2, %v1154_v28  ;;  %v2584_v28 = vor.u32 %v2919_v1, %v2583_v24  ;;  %v2585_v2 = vld [vmem:[#allocation2 + $0xfc] sm:$0xf0] }
 0x704   :  { %1429 = vmatpush.bf16.msra.mxu1 %v2604_v23 }
 0x705   :  { %v3465_v21 = vadd.f32 %v1168_v29, %v3401_v20  ;;  %v2591_v29 = vld [vmem:[#allocation2 + $0xf8] sm:$0xf]  ;;  %1402 = vmatpush.bf16.msrb.mxu3 %v2584_v28 }
 0x707   :  { %1178 = vadd.xlane.f32.xlu2 %v3465_v21 }
 0x772   :  { %v1177_v31 = vpop.xlane.xlu1 %1176 }
 0x773   :  { %v1180_v32 = vmul.f32 %v1177_v31, %v3289_v8  ;;  %v2920_v31 = vld [vmem:[#allocation2 + $0x100] sm:$0xf0] }
 0x775   :  { %v3470_v33 = vsub.f32 %v3461_v26, %v1180_v32  ;;  %v2588_v32 = vor.u32 %v2918_v27, %v2585_v2 }
 0x777   :  { %v1184_v13 = vmul.f32 %v3470_v33, %v3470_v33  ;;  %1416 = vmatpush.bf16.msra.mxu0 %v2588_v32 }
 0x779   :  { %1186 = vadd.xlane.f32.xlu2 %v1184_v13  ;;  %v2592_v13 = vor.u32 %v2920_v31, %v2591_v29 }
 0x77a   :  { %v1179_v34 = vpop.xlane.xlu2 %1178 }
 0x77b   :  { %v1181_v35 = vmul.f32 %v1179_v34, %v3289_v8  ;;  %1430 = vmatpush.bf16.msra.mxu1 %v2592_v13  ;;  %v2571_v34 = vld [vmem:[#allocation2 + $0xd8] sm:$0xf] }
 0x77d   :  { %v3476_v36 = vsub.f32 %v3465_v21, %v1181_v35  ;;  %v2916_v35 = vld [vmem:[#allocation2 + $0xe0] sm:$0xf0] }
 0x77e   :  { %v2572_v38 = vor.u32 %v2916_v35, %v2571_v34 }
 0x77f   :  { %v1185_v20 = vmul.f32 %v3476_v36, %v3476_v36  ;;  %1431 = vmatpush.bf16.msra.mxu1 %v2580_v43 }
 0x780   :  { %1403 = vmatpush.bf16.msrb.mxu3 %v2572_v38 }
 0x781   :  { %1188 = vadd.xlane.f32.xlu2 %v1185_v20  ;;  %v2915_v20 = vld [vmem:[#allocation2 + $0xdc] sm:$0xf] }
 0x782   :  { %v2576_v42 = vor.u32 %v2915_v20, %v2573_v39 }
 0x783   :  { %1432 = vmatpush.bf16.msra.mxu1 %v2568_v52 }
 0x784   :  { %1417 = vmatpush.bf16.msra.mxu0 %v2576_v42  ;;  %1404 = vmatpush.bf16.msrb.mxu3 %v2560_v46 }
 0x788   :  { %1418 = vmatpush.bf16.msra.mxu0 %v2564_v51 }
 0x7ec   :  { %v1187_v37 = vpop.xlane.xlu2 %1186 }
 0x7ed   :  { %v1190_v30 = vmul.f32 %v1187_v37, %v3289_v8 }
 0x7ef   :  { %v1192_v50 = vadd.f32 1e-05, %v1190_v30 }
 0x7f1   :  { %3049 = vrsqrt.f32 %v1192_v50  ;;  %vm1200_vm13 = vweird.f32 %v1192_v50 }
 0x7f4   :  { %v1189_v53 = vpop.xlane.xlu2 %1188 }
 0x7f5   :  { %v1191_v55 = vmul.f32 %v1189_v53, %v3289_v8 }
 0x7f7   :  { %v3050_v56 = vpop.eup %3049  ;;  %v1193_v57 = vadd.f32 1e-05, %v1191_v55 }
 0x7f8   :  { %v1195_v11 = vmul.f32 %v3050_v56, %v1192_v50  ;;  %vm1201_vm12 = vweird.f32 %v3050_v56 }
 0x7f9   :  { %3051 = vrsqrt.f32 %v1193_v57  ;;  %vm1202_vm15 = vmor %vm1200_vm13, %vm1201_vm12  ;;  %vm1210_vm1 = vweird.f32 %v1193_v57 }
 0x7fa   :  { %v1196_v59 = vmul.f32 %v3050_v56, %v1195_v11 }
 0x7fc   :  { %v1197_v60 = vmul.f32 0.5, %v1196_v59 }
 0x7fe   :  { %v1198_v61 = vsub.f32 1.5, %v1197_v60 }
 0x7ff   :  { %v3052_v15 = vpop.eup %3051 }
 0x800   :  { %v1199_v62 = vmul.f32 %v3050_v56, %v1198_v61  ;;  %v1205_v63 = vmul.f32 %v3052_v15, %v1193_v57  ;;  %vm1211_vm0 = vweird.f32 %v3052_v15 }
 0x801   :  { %vm1212_vm2 = vmor %vm1210_vm1, %vm1211_vm0 }
 0x802   :  { %v1206_v3 = vmul.f32 %v3052_v15, %v1205_v63  ;;  %v1203_v4 = vsel %vm1202_vm15, %v3050_v56, %v1199_v62 }
 0x803   :  { %v1214_v9 = vmul.f32 %v1203_v4, %v3470_v33  ;;  %v2556_v33 = vld [vmem:[%s3648_s5 + $0x3] sm:$0x7] }
 0x804   :  { %v1207_v5 = vmul.f32 0.5, %v1206_v3  ;;  %v1264_v23 = vperm.slane %v2556_v33, 1  ;;  %v1265_v24 = vperm.slane %v2556_v33, 2  ;;  %v1263_v29 = vperm.slane %v2556_v33, 0 }
 0x805   :  { %v1219_v17 = vmul.f32 %v2999_v10, %v1214_v9 }
 0x806   :  { %v1208_v7 = vsub.f32 1.5, %v1207_v5 }
 0x807   :  { %v1224_v0 = vadd.f32 %v3000_v18, %v1219_v17 }
 0x808   :  { %v1209_v12 = vmul.f32 %v3052_v15, %v1208_v7 }
 0x80a   :  { %v1213_v14 = vsel %vm1212_vm2, %v3052_v15, %v1209_v12 }
 0x80b   :  { %v1215_v16 = vmul.f32 %v1213_v14, %v3476_v36 }
 0x80d   :  { %v1220_v19 = vmul.f32 %v2999_v10, %v1215_v16 }
 0x80f   :  { %v1225_v58 = vadd.f32 %v3000_v18, %v1220_v19 }
 0x811   :  { %v1226_v6 = vpack.c.bf16 %v1225_v58, %v1224_v0 }
 0x813   :  { %1405 = vmatmul.bf16.vlgmr.msrb.gmra.mxu3 %v1226_v6  ;;  %1419 = vmatmul.bf16.vlgmr.msra.gmra.mxu0 %v1226_v6 }
 0x814   :  { %1433 = vmatmul.bf16.vlgmr.msra.gmra.mxu1 %v1226_v6 }
 0x890   :  { %v1420_v1 = vpop.f32.mrf.mxu0 }
 0x891   :  { %v1421_v36 = vadd.f32 %v1420_v1, %v1264_v23  ;;  %v1434_v27 = vpop.f32.mrf.mxu1 }
 0x892   :  { %v1435_v28 = vadd.f32 %v1434_v27, %v1265_v24 }
 0x893   :  { %v1458_v2 = vpack.c.bf16 %v1421_v36, %v1421_v36 }
 0x894   :  { %v3493_v31 = vpack.c.bf16 %v1435_v28, %v1435_v28 }
 0x895   :  { %v1464_v32 = vsel %vm414_vm7, %v1458_v2, 0  ;;  %v1569_v13 = vunpack.c.l.b16 %v1458_v2 }
 0x896   :  { %v1528_v34 = vsel %vm483_vm8, %v3493_v31, 0  ;;  %v1406_v35 = vpop.f32.mrf.mxu3  ;;  %1473 = vmatpush.bf16.xpose.msra.mxu2 %v1464_v32  ;;  %v1646_v28 = vunpack.c.l.b16 %v3493_v31 }
 0x897   :  { %v1407_v20 = vadd.f32 %v1406_v35, %v1263_v29  ;;  %1537 = vmatpush.bf16.msra.mxu3 %v1528_v34  ;;  %v1570_v37 = vpack.c.b16 %v1569_v13, %v1569_v13 }
 0x898   :  { %v1422_v38 = vpop.f32.mrf.mxu0  ;;  %v1647_v2 = vpack.c.b16 %v1646_v28, %v1646_v28 }
 0x899   :  { %v1456_v39 = vpack.c.bf16 %v1407_v20, %v1407_v20  ;;  %v1423_v40 = vadd.f32 %v1422_v38, %v1264_v23  ;;  %v1436_v41 = vpop.f32.mrf.mxu1  ;;  %1571 = vrot.lane.b32.xlu2 %v1570_v37, %s3176_s26 }
 0x89a   :  { %v1437_v30 = vadd.f32 %v1436_v41, %v1265_v24 }
 0x89b   :  { %v1459_v42 = vpack.c.bf16 %v1423_v40, %v1423_v40  ;;  %v1564_v43 = vunpack.c.l.b16 %v1456_v39 }
 0x89c   :  { %v3499_v44 = vpack.c.bf16 %v1437_v30, %v1437_v30 }
 0x89d   :  { %v1483_v45 = vsel %vm414_vm7, %v1459_v42, 0  ;;  %2669 = vmatmul.msk.bf16.vlgmr.msra.gmra.mxu2 %vm414_vm7, %v1456_v39  ;;  %v1565_v22 = vpack.c.b16 %v1564_v43, %v1564_v43  ;;  %v1598_v46 = vunpack.c.l.b16 %v1459_v42 }
 0x89e   :  { %v1547_v48 = vsel %vm483_vm8, %v3499_v44, 0  ;;  %v1408_v49 = vpop.f32.mrf.mxu3  ;;  %1492 = vmatpush.bf16.xpose.msrb.mxu2 %v1483_v45  ;;  %v1670_v30 = vunpack.c.l.b16 %v3499_v44  ;;  %v2939_v44 = vld [vmem:[%s3649_s6 + $0x58] sm:$0xff] }
 0x89f   :  { %v1409_v25 = vadd.f32 %v1408_v49, %v1263_v29  ;;  %1556 = vmatpush.bf16.msrb.mxu0 %v1547_v48  ;;  %1566 = vrot.lane.b32.xlu1 %v1565_v22, %s3176_s26  ;;  %v1599_v50 = vpack.c.b16 %v1598_v46, %v1598_v46 }
 0x8a0   :  { %v1671_v43 = vpack.c.b16 %v1670_v30, %v1670_v30  ;;  %v2957_v30 = vld [vmem:[#allocation4 + $0xe4] sm:$0xf0] }
 0x8a1   :  { %v1457_v51 = vpack.c.bf16 %v1409_v25, %v1409_v25  ;;  %1600 = vrot.lane.b32.xlu0 %v1599_v50, %s3176_s26 }
 0x8a3   :  { %v1593_v52 = vunpack.c.l.b16 %v1457_v51 }
 0x8a5   :  { %v1594_v53 = vpack.c.b16 %v1593_v52, %v1593_v52  ;;  %v2937_v52 = vld [vmem:[%s3649_s6 + $0x48] sm:$0xff] }
 0x8a7   :  { %1595 = vrot.lane.b32.xlu2 %v1594_v53, %s3176_s26 }
 0x8ad   :  { %2670 = vmatmul.msk.bf16.vlgmr.msrb.gmra.mxu2 %vm414_vm7, %v1457_v51  ;;  %v2938_v51 = vld [vmem:[%s3649_s6 + $0x50] sm:$0xff] }
 0x8f3   :  { %v1572_v55 = vpop.permute.xlu2 %1571 }
 0x8f4   :  { %v1577_v56 = vsel %vm414_vm7, %v1572_v55, 0 }
 0x8f5   :  { %1586 = vmatpush.bf16.xpose.msrb.mxu1 %v1577_v56 }
 0x901   :  { %v1596_v60 = vpop.permute.xlu2 %1595 }
 0x911   :  { %v1567_v57 = vpop.permute.xlu1 %1566 }
 0x912   :  { %2673 = vmatmul.msk.bf16.vlgmr.msrb.gmra.mxu1 %vm414_vm7, %v1567_v57  ;;  %v2936_v57 = vld [vmem:[%s3649_s6 + $0x40] sm:$0xff] }
 0x913   :  { %v1601_v11 = vpop.permute.xlu0 %1600 }
 0x914   :  { %v1606_v59 = vsel %vm414_vm7, %v1601_v11, 0 }
 0x915   :  { %1615 = vmatpush.bf16.xpose.msra.mxu2 %v1606_v59  ;;  %v2943_v59 = vld [vmem:[%s3649_s6 + $0x78] sm:$0xff] }
 0x916   :  { %1725 = vmatpush.bf16.msra.mxu1 %v2943_v59  ;;  %v2951_v59 = vld [vmem:[#allocation4 + $0xb4] sm:$0xf0] }
 0x91c   :  { %2674 = vmatmul.msk.bf16.vlgmr.msra.gmra.mxu2 %vm414_vm7, %v1596_v60 }
 0x91d   :  { %1766 = vmatpush.bf16.msrb.mxu2 %v2939_v44  ;;  %v2759_v44 = vld [vmem:[#allocation4 + $0xd8] sm:$0xf0] }
 0x920   :  { %v1475_v61 = vpop.f32.mrf.mxu2 }
 0x921   :  { %v1476_v15 = vadd.f32 %v1475_v61, %v3340_v47  ;;  %1767 = vmatpush.bf16.msrb.mxu2 %v2938_v51  ;;  %v2749_v51 = vld [vmem:[#allocation4 + $0xc0] sm:$0xf] }
 0x923   :  { %v1498_v62 = vsel %vm453_vm14, %v1476_v15, -inf }
 0x924   :  { %1499 = vmax.xlane.f32.xlu0 %v1498_v62 }
 0x925   :  { %1768 = vmatpush.bf16.msrb.mxu2 %v2937_v52  ;;  %v2953_v52 = vld [vmem:[#allocation4 + $0xc4] sm:$0xf0] }
 0x928   :  { %v1477_v63 = vpop.f32.mrf.mxu2 }
 0x929   :  { %1769 = vmatpush.bf16.msrb.mxu2 %v2936_v57 }
 0x930   :  { %v1494_v3 = vpop.f32.mrf.mxu2 }
 0x931   :  { %v1495_v4 = vadd.f32 %v1494_v3, %v3345_v54 }
 0x933   :  { %v1501_v5 = vsel %vm453_vm14, %v1495_v4, -inf }
 0x934   :  { %1502 = vmax.xlane.f32.xlu2 %v1501_v5 }
 0x938   :  { %v1496_v7 = vpop.f32.mrf.mxu2 }
 0x98f   :  { %v1588_v9 = vpop.f32.mrf.mxu1 }
 0x990   :  { %v1589_v10 = vadd.f32 %v1588_v9, %v3340_v47 }
 0x992   :  { %v1621_v12 = vsel %vm453_vm14, %v1589_v10, -inf }
 0x993   :  { %1622 = vmax.xlane.f32.xlu1 %v1621_v12  ;;  %v2941_v12 = vld [vmem:[%s3649_s6 + $0x68] sm:$0xff] }
 0x997   :  { %v1590_v14 = vpop.f32.mrf.mxu1  ;;  %v1500_v16 = vpop.xlane.xlu0 %1499 }
 0x998   :  { %v1504_v17 = vsub.f32 %v1476_v15, %v1500_v16  ;;  %v2940_v14 = vld [vmem:[%s3649_s6 + $0x60] sm:$0xff] }
 0x99a   :  { %v1506_v18 = vmul.f32 1.442695, %v1504_v17 }
 0x99c   :  { %3053 = vpow2.f32 %v1506_v18 }
 0x99f   :  { %v1617_v19 = vpop.f32.mrf.mxu2 }
 0x9a0   :  { %v1618_v0 = vadd.f32 %v1617_v19, %v3345_v54 }
 0x9a2   :  { %v3054_v58 = vpop.eup %3053  ;;  %v1624_v6 = vsel %vm453_vm14, %v1618_v0, -inf }
 0x9a3   :  { %1625 = vmax.xlane.f32.xlu0 %v1624_v6  ;;  %v1510_v33 = vsel %vm453_vm14, %v3054_v58, 0.0 }
 0x9a4   :  { %1511 = vadd.xlane.f32.xlu2 %v1510_v33 }
 0x9a7   :  { %v1619_v23 = vpop.f32.mrf.mxu2  ;;  %v1503_v47 = vpop.xlane.xlu2 %1502 }
 0x9a8   :  { %v1505_v24 = vsub.f32 %v1495_v4, %v1503_v47  ;;  %v3001_v23 = vld [vmem:[%s3650_s7 + $0x1] ss:$0 sm:$0xff] }
 0x9aa   :  { %v1508_v1 = vmul.f32 1.442695, %v1505_v24 }
 0x9ac   :  { %3055 = vpow2.f32 %v1508_v1 }
 0x9b2   :  { %v3056_v36 = vpop.eup %3055 }
 0x9b3   :  { %v1513_v27 = vsel %vm453_vm14, %v3056_v36, 0.0 }
 0x9b4   :  { %1514 = vadd.xlane.f32.xlu1 %v1513_v27 }
 0x9cd   :  { %1648 = vrot.lane.b32.xlu1 %v1647_v2, %s3176_s26 }
 0xa06   :  { %v1623_v54 = vpop.xlane.xlu1 %1622 }
 0xa07   :  { %v1627_v29 = vsub.f32 %v1589_v10, %v1623_v54  ;;  %v2942_v10 = vld [vmem:[%s3649_s6 + $0x70] sm:$0xff] }
 0xa08   :  { %1726 = vmatpush.bf16.msra.mxu1 %v2942_v10  ;;  %v2725_v10 = vld [vmem:[#allocation4 + $0x90] sm:$0xf] }
 0xa09   :  { %v1629_v32 = vmul.f32 1.442695, %v1627_v29 }
 0xa0b   :  { %3057 = vpow2.f32 %v1629_v32 }
 0xa0c   :  { %1727 = vmatpush.bf16.msra.mxu1 %v2941_v12  ;;  %v2947_v12 = vld [vmem:[#allocation4 + $0x94] sm:$0xf0] }
 0xa10   :  { %1728 = vmatpush.bf16.msra.mxu1 %v2940_v14  ;;  %v2946_v14 = vld [vmem:[#allocation4 + $0x94] sm:$0xf] }
 0xa11   :  { %v3058_v13 = vpop.eup %3057 }
 0xa12   :  { %v1633_v34 = vsel %vm453_vm14, %v3058_v13, 0.0 }
 0xa13   :  { %1634 = vadd.xlane.f32.xlu0 %v1633_v34 }
 0xa16   :  { %v1626_v35 = vpop.xlane.xlu0 %1625 }
 0xa17   :  { %v1628_v20 = vsub.f32 %v1618_v0, %v1626_v35  ;;  %v1512_v37 = vpop.xlane.xlu2 %1511 }
 0xa18   :  { %3059 = vrcp.f32 %v1512_v37  ;;  %v2959_v37 = vld [vmem:[#allocation4 + $0xf4] sm:$0xf0] }
 0xa19   :  { %v1631_v38 = vmul.f32 1.442695, %v1628_v20  ;;  %v2773_v20 = vld [vmem:[#allocation4 + $0xf0] sm:$0xf] }
 0xa1b   :  { %3061 = vpow2.f32 %v1631_v38  ;;  %v2958_v38 = vld [vmem:[#allocation4 + $0xf4] sm:$0xf] }
 0xa1e   :  { %v3060_v39 = vpop.eup %3059 }
 0xa1f   :  { %v1518_v40 = vmul.f32 %v3060_v39, %v3054_v58  ;;  %v2774_v39 = vor.u32 %v2959_v37, %v2773_v20 }
 0xa21   :  { %v3062_v31 = vpop.eup %3061  ;;  %v1520_v41 = vpack.c.bf16 %v1518_v40, %v1518_v40  ;;  %v2775_v40 = vld [vmem:[#allocation4 + $0xf8] sm:$0xf0] }
 0xa22   :  { %v1636_v42 = vsel %vm453_vm14, %v3062_v31, 0.0 }
 0xa23   :  { %2671 = vmatmul.msk.bf16.vlgmr.msra.gmra.mxu3 %vm453_vm14, %v1520_v41  ;;  %1637 = vadd.xlane.f32.xlu2 %v1636_v42  ;;  %v2765_v41 = vld [vmem:[#allocation4 + $0xe0] sm:$0xf]  ;;  %v2956_v42 = vld [vmem:[#allocation4 + $0xe4] sm:$0xf] }
 0xa27   :  { %v1515_v45 = vpop.xlane.xlu1 %1514  ;;  %1672 = vrot.lane.b32.xlu0 %v1671_v43, %s3176_s26  ;;  %v2766_v43 = vor.u32 %v2957_v30, %v2765_v41 }
 0xa28   :  { %3063 = vrcp.f32 %v1515_v45  ;;  %v2767_v45 = vld [vmem:[#allocation4 + $0xe8] sm:$0xf0] }
 0xa2e   :  { %v3064_v22 = vpop.eup %3063 }
 0xa2f   :  { %v1519_v46 = vmul.f32 %v3064_v22, %v3056_v36  ;;  %v2770_v22 = vor.u32 %v2956_v42, %v2767_v45  ;;  %v3002_v42 = vld [vmem:[%s3651_s8 + $0x1] ss:$0 sm:$0xff] }
 0xa31   :  { %v1521_v48 = vpack.c.bf16 %v1519_v46, %v1519_v46  ;;  %v2757_v46 = vld [vmem:[#allocation4 + $0xd0] sm:$0xf] }
 0xa33   :  { %2672 = vmatmul.msk.bf16.vlgmr.msrb.gmra.mxu0 %vm453_vm14, %v1521_v48  ;;  %v2955_v48 = vld [vmem:[#allocation4 + $0xd4] sm:$0xf0] }
 0xa3f   :  { %v1649_v49 = vpop.permute.xlu1 %1648 }
 0xa40   :  { %v1654_v25 = vsel %vm483_vm8, %v1649_v49, 0  ;;  %v2954_v49 = vld [vmem:[#allocation4 + $0xd4] sm:$0xf] }
 0xa41   :  { %1663 = vmatpush.bf16.msrb.mxu3 %v1654_v25  ;;  %v2758_v25 = vor.u32 %v2955_v48, %v2757_v46  ;;  %v3003_v48 = vld [vmem:[%s3652_s9 + $0x1] ss:$0 sm:$0xff] }
 0xa45   :  { %1944 = vmatpush.bf16.msra.mxu3 %v2774_v39 }
 0xa49   :  { %1945 = vmatpush.bf16.msra.mxu3 %v2766_v43 }
 0xa4d   :  { %1946 = vmatpush.bf16.msra.mxu3 %v2758_v25 }
 0xa86   :  { %v1635_v50 = vpop.xlane.xlu0 %1634 }
 0xa87   :  { %3065 = vrcp.f32 %v1635_v50  ;;  %v2762_v50 = vor.u32 %v2954_v49, %v2759_v44 }
 0xa8d   :  { %v3066_v53 = vpop.eup %3065 }
 0xa8e   :  { %v1641_v55 = vmul.f32 %v3066_v53, %v3058_v13  ;;  %v2952_v53 = vld [vmem:[#allocation4 + $0xc4] sm:$0xf] }
 0xa90   :  { %v1643_v56 = vpack.c.bf16 %v1641_v55, %v1641_v55  ;;  %v2750_v55 = vor.u32 %v2953_v52, %v2749_v51  ;;  %v2974_v51 = vld [vmem:[#allocation6 + $0xf0] sm:$0xff]  ;;  %v2967_v52 = vld [vmem:[#allocation6 + $0xb8] sm:$0xff] }
 0xa91   :  { %2192 = vmatpush.bf16.msrb.mxu1 %v2967_v52 }
 0xa92   :  { %2675 = vmatmul.msk.bf16.vlgmr.msrb.gmra.mxu3 %vm453_vm14, %v1643_v56  ;;  %v2751_v56 = vld [vmem:[#allocation4 + $0xc8] sm:$0xf0] }
 0xa93   :  { %v2754_v57 = vor.u32 %v2952_v53, %v2751_v56  ;;  %1947 = vmatpush.bf16.msra.mxu3 %v2750_v55  ;;  %v2973_v53 = vld [vmem:[#allocation6 + $0xe8] sm:$0xff]  ;;  %v2714_v55 = vld [vmem:[%s3654_s11 + $0x2] sm:$0x3] }
 0xa94   :  { %v2972_v56 = vld [vmem:[#allocation6 + $0xe0] sm:$0xff] }
 0xa96   :  { %v1638_v11 = vpop.xlane.xlu2 %1637 }
 0xa97   :  { %3067 = vrcp.f32 %v1638_v11  ;;  %v2741_v11 = vld [vmem:[#allocation4 + $0xb0] sm:$0xf] }
 0xa99   :  { %v1673_v60 = vpop.permute.xlu0 %1672 }
 0xa9a   :  { %v1678_v61 = vsel %vm483_vm8, %v1673_v60, 0  ;;  %v2950_v60 = vld [vmem:[#allocation4 + $0xb4] sm:$0xf] }
 0xa9b   :  { %1687 = vmatpush.bf16.msra.mxu0 %v1678_v61  ;;  %v2742_v61 = vor.u32 %v2951_v59, %v2741_v11  ;;  %v1861_v11 = vperm.slane %v2714_v55, 1  ;;  %v2971_v59 = vld [vmem:[#allocation6 + $0xd8] sm:$0xff] }
 0xa9d   :  { %v3068_v15 = vpop.eup %3067  ;;  %1948 = vmatpush.bf16.msra.mxu3 %v2742_v61  ;;  %v2964_v61 = vld [vmem:[#allocation6 + $0xa0] sm:$0xff] }
 0xa9e   :  { %v1642_v62 = vmul.f32 %v3068_v15, %v3062_v31  ;;  %v2778_v31 = vor.u32 %v2958_v38, %v2775_v40  ;;  %v2743_v15 = vld [vmem:[#allocation4 + $0xb8] sm:$0xf0] }
 0xaa0   :  { %v1644_v63 = vpack.c.bf16 %v1642_v62, %v1642_v62  ;;  %1958 = vmatpush.bf16.msrb.mxu0 %v2778_v31  ;;  %v2746_v62 = vor.u32 %v2950_v60, %v2743_v15 }
 0xaa2   :  { %2676 = vmatmul.msk.bf16.vlgmr.msra.gmra.mxu0 %vm453_vm14, %v1644_v63  ;;  %v2733_v63 = vld [vmem:[#allocation4 + $0xa0] sm:$0xf] }
 0xaa4   :  { %1959 = vmatpush.bf16.msrb.mxu0 %v2770_v22 }
 0xaa6   :  { %v1539_v3 = vpop.f32.mrf.mxu3 }
 0xaa8   :  { %1960 = vmatpush.bf16.msrb.mxu0 %v2762_v50 }
 0xaac   :  { %1961 = vmatpush.bf16.msrb.mxu0 %v2754_v57  ;;  %v2965_v57 = vld [vmem:[#allocation6 + $0xa8] sm:$0xff] }
 0xaae   :  { %v1541_v4 = vpop.f32.mrf.mxu3 }
 0xaaf   :  { %v2948_v4 = vld [vmem:[#allocation4 + $0xa4] sm:$0xf] }
 0xab0   :  { %v1558_v5 = vpop.f32.mrf.mxu0  ;;  %1962 = vmatpush.bf16.msrb.mxu0 %v2746_v62  ;;  %v2970_v62 = vld [vmem:[#allocation6 + $0xd0] sm:$0xff] }
 0xab1   :  { %v1562_v7 = vpack.c.bf16 %v1558_v5, %v1539_v3  ;;  %v2949_v3 = vld [vmem:[#allocation4 + $0xa4] sm:$0xf0] }
 0xab2   :  { %v2734_v5 = vor.u32 %v2949_v3, %v2733_v63  ;;  %v1860_v3 = vperm.slane %v2714_v55, 0 }
 0xab3   :  { %2710 = vmatmul.msk.bf16.vlgmr.msrb.gmra.mxu2 %vm414_vm7, %v1562_v7  ;;  %v2735_v7 = vld [vmem:[#allocation4 + $0xa8] sm:$0xf0] }
 0xab4   :  { %1949 = vmatpush.bf16.msra.mxu3 %v2734_v5 }
 0xab8   :  { %v1560_v9 = vpop.f32.mrf.mxu0 }
 0xab9   :  { %v2738_v9 = vor.u32 %v2948_v4, %v2735_v7  ;;  %v2963_v4 = vld [vmem:[#allocation6 + $0x98] sm:$0xff] }
 0xabb   :  { %1963 = vmatpush.bf16.msrb.mxu0 %v2738_v9  ;;  %v2969_v9 = vld [vmem:[#allocation6 + $0xc8] sm:$0xff] }
 0xb15   :  { %v1665_v16 = vpop.f32.mrf.mxu3 }
 0xb1d   :  { %v1667_v17 = vpop.f32.mrf.mxu3 }
 0xb1e   :  { %v2726_v17 = vor.u32 %v2947_v12, %v2725_v10 }
 0xb1f   :  { %v1689_v18 = vpop.f32.mrf.mxu0 }
 0xb20   :  { %v1693_v19 = vpack.c.bf16 %v1689_v18, %v1665_v16  ;;  %v2727_v18 = vld [vmem:[#allocation4 + $0x98] sm:$0xf0]  ;;  %1950 = vmatpush.bf16.msra.mxu3 %v2726_v17 }
 0xb22   :  { %2693 = vmatmul.msk.bf16.vlgmr.msra.gmra.mxu1 %vm414_vm7, %v1693_v19  ;;  %v2717_v19 = vld [vmem:[#allocation4 + $0x80] sm:$0xf] }
 0xb27   :  { %v1691_v0 = vpop.f32.mrf.mxu0 }
 0xb28   :  { %v2945_v0 = vld [vmem:[#allocation4 + $0x84] sm:$0xf0] }
 0xb36   :  { %v1771_v58 = vpop.f32.mrf.mxu2 }
 0xb3e   :  { %v1773_v1 = vpop.f32.mrf.mxu2 }
 0xb9f   :  { %v1730_v6 = vpop.f32.mrf.mxu1 }
 0xba0   :  { %v1772_v33 = vadd.f32 %v1771_v58, %v1730_v6  ;;  %v2730_v6 = vor.u32 %v2946_v14, %v2727_v18  ;;  %v2962_v14 = vld [vmem:[#allocation6 + $0x90] sm:$0xff]  ;;  %v2968_v18 = vld [vmem:[#allocation6 + $0xc0] sm:$0xff] }
 0xba2   :  { %v1776_v47 = vadd.f32 %v1772_v33, %v3461_v26  ;;  %v2944_v33 = vld [vmem:[#allocation4 + $0x84] sm:$0xf]  ;;  %1964 = vmatpush.bf16.msrb.mxu0 %v2730_v6 }
 0xba4   :  { %v3565_v24 = vadd.f32 %v3001_v23, %v1776_v47  ;;  %v2718_v47 = vor.u32 %v2945_v0, %v2717_v19 }
 0xba6   :  { %1789 = vadd.xlane.f32.xlu2 %v3565_v24  ;;  %1951 = vmatpush.bf16.msra.mxu3 %v2718_v47 }
 0xba7   :  { %v1732_v36 = vpop.f32.mrf.mxu1 }
 0xba8   :  { %v1774_v27 = vadd.f32 %v1773_v1, %v1732_v36 }
 0xbaa   :  { %v1777_v28 = vadd.f32 %v1774_v27, %v3465_v21 }
 0xbac   :  { %v3569_v2 = vadd.f32 %v3001_v23, %v1777_v28  ;;  %v2719_v23 = vld [vmem:[#allocation4 + $0x88] sm:$0xf0] }
 0xbad   :  { %v2722_v36 = vor.u32 %v2944_v33, %v2719_v23 }
 0xbae   :  { %1791 = vadd.xlane.f32.xlu2 %v3569_v2 }
 0xbaf   :  { %1965 = vmatpush.bf16.msrb.mxu0 %v2722_v36  ;;  %v2960_v36 = vld [vmem:[#allocation6 + $0x80] sm:$0xff] }
 0xc19   :  { %v1790_v54 = vpop.xlane.xlu2 %1789 }
 0xc1a   :  { %v1793_v29 = vmul.f32 %v1790_v54, %v3289_v8 }
 0xc1c   :  { %v3574_v32 = vsub.f32 %v3565_v24, %v1793_v29 }
 0xc1e   :  { %v1797_v26 = vmul.f32 %v3574_v32, %v3574_v32 }
 0xc20   :  { %1799 = vadd.xlane.f32.xlu2 %v1797_v26 }
 0xc21   :  { %v1792_v13 = vpop.xlane.xlu2 %1791 }
 0xc22   :  { %v1794_v34 = vmul.f32 %v1792_v13, %v3289_v8 }
 0xc24   :  { %v3580_v35 = vsub.f32 %v3569_v2, %v1794_v34 }
 0xc26   :  { %v1798_v21 = vmul.f32 %v3580_v35, %v3580_v35 }
 0xc28   :  { %1801 = vadd.xlane.f32.xlu0 %v1798_v21 }
 0xc93   :  { %v1800_v16 = vpop.xlane.xlu2 %1799 }
 0xc94   :  { %v1803_v58 = vmul.f32 %v1800_v16, %v3289_v8 }
 0xc96   :  { %v1805_v1 = vadd.f32 1e-05, %v1803_v58  ;;  %v2961_v58 = vld [vmem:[#allocation6 + $0x88] sm:$0xff] }
 0xc98   :  { %3069 = vrsqrt.f32 %v1805_v1  ;;  %vm1813_vm8 = vweird.f32 %v1805_v1 }
 0xc9b   :  { %v1802_v27 = vpop.xlane.xlu0 %1801 }
 0xc9c   :  { %v1804_v28 = vmul.f32 %v1802_v27, %v3289_v8 }
 0xc9e   :  { %v3070_v54 = vpop.eup %3069  ;;  %v1806_v29 = vadd.f32 1e-05, %v1804_v28 }
 0xc9f   :  { %v1808_v26 = vmul.f32 %v3070_v54, %v1805_v1  ;;  %vm1814_vm7 = vweird.f32 %v3070_v54 }
 0xca0   :  { %3071 = vrsqrt.f32 %v1806_v29  ;;  %vm1815_vm14 = vmor %vm1813_vm8, %vm1814_vm7  ;;  %vm1823_vm4 = vweird.f32 %v1806_v29 }
 0xca1   :  { %v1809_v13 = vmul.f32 %v3070_v54, %v1808_v26 }
 0xca3   :  { %v1810_v34 = vmul.f32 0.5, %v1809_v13 }
 0xca5   :  { %v1811_v21 = vsub.f32 1.5, %v1810_v34 }
 0xca6   :  { %v3072_v20 = vpop.eup %3071 }
 0xca7   :  { %v1812_v37 = vmul.f32 %v3070_v54, %v1811_v21  ;;  %v1818_v38 = vmul.f32 %v3072_v20, %v1806_v29  ;;  %vm1824_vm3 = vweird.f32 %v3072_v20 }
 0xca8   :  { %vm1825_vm5 = vmor %vm1823_vm4, %vm1824_vm3 }
 0xca9   :  { %v1819_v39 = vmul.f32 %v3072_v20, %v1818_v38  ;;  %v1816_v40 = vsel %vm1815_vm14, %v3070_v54, %v1812_v37 }
 0xcaa   :  { %v1827_v30 = vmul.f32 %v1816_v40, %v3574_v32  ;;  %v2975_v32 = vld [vmem:[#allocation6 + $0xf8] sm:$0xff] }
 0xcab   :  { %v1820_v31 = vmul.f32 0.5, %v1819_v39  ;;  %2206 = vmatpush.bf16.msra.mxu2 %v2975_v32 }
 0xcac   :  { %v1832_v46 = vmul.f32 %v3002_v42, %v1827_v30 }
 0xcad   :  { %v1821_v41 = vsub.f32 1.5, %v1820_v31 }
 0xcae   :  { %v1837_v25 = vadd.f32 %v3003_v48, %v1832_v46 }
 0xcaf   :  { %v1822_v43 = vmul.f32 %v3072_v20, %v1821_v41  ;;  %2207 = vmatpush.bf16.msra.mxu2 %v2974_v51 }
 0xcb1   :  { %v1826_v45 = vsel %vm1825_vm5, %v3072_v20, %v1822_v43 }
 0xcb2   :  { %v1828_v22 = vmul.f32 %v1826_v45, %v3580_v35  ;;  %v2966_v35 = vld [vmem:[#allocation6 + $0xb0] sm:$0xff] }
 0xcb3   :  { %2208 = vmatpush.bf16.msra.mxu2 %v2973_v53  ;;  %2193 = vmatpush.bf16.msrb.mxu1 %v2966_v35 }
 0xcb4   :  { %v1833_v49 = vmul.f32 %v3002_v42, %v1828_v22 }
 0xcb6   :  { %v1838_v44 = vadd.f32 %v3003_v48, %v1833_v49 }
 0xcb7   :  { %2209 = vmatpush.bf16.msra.mxu2 %v2972_v56  ;;  %2194 = vmatpush.bf16.msrb.mxu1 %v2965_v57 }
 0xcb8   :  { %v1839_v50 = vpack.c.bf16 %v1838_v44, %v1837_v25 }
 0xcba   :  { %1952 = vmatmul.bf16.vlgmr.msra.gmra.mxu3 %v1839_v50  ;;  %1966 = vmatmul.bf16.vlgmr.msrb.gmra.mxu0 %v1839_v50 }
 0xcbb   :  { %2210 = vmatpush.bf16.msra.mxu2 %v2971_v59  ;;  %2195 = vmatpush.bf16.msrb.mxu1 %v2964_v61 }
 0xcbf   :  { %2211 = vmatpush.bf16.msra.mxu2 %v2970_v62  ;;  %2196 = vmatpush.bf16.msrb.mxu1 %v2963_v4 }
 0xcc3   :  { %2212 = vmatpush.bf16.msra.mxu2 %v2969_v9  ;;  %2197 = vmatpush.bf16.msrb.mxu1 %v2962_v14 }
 0xcc7   :  { %2213 = vmatpush.bf16.msra.mxu2 %v2968_v18  ;;  %2198 = vmatpush.bf16.msrb.mxu1 %v2961_v58 }
 0xccb   :  { %2199 = vmatpush.bf16.msrb.mxu1 %v2960_v36 }
 0xd37   :  { %v1967_v60 = vpop.f32.mrf.mxu0 }
 0xd38   :  { %v3597_v15 = vadd.f32 %v1967_v60, %v1861_v11 }
 0xd3a   :  { %v2780_v63 = vmul.f32 -1.702, %v3597_v15 }
 0xd3c   :  { %v1982_v5 = vmul.f32 1.442695, %v2780_v63 }
 0xd3d   :  { %v1953_v7 = vpop.f32.mrf.mxu3 }
 0xd3e   :  { %3073 = vpow2.f32 %v1982_v5  ;;  %v3600_v10 = vadd.f32 %v1953_v7, %v1860_v3 }
 0xd3f   :  { %v1969_v12 = vpop.f32.mrf.mxu0 }
 0xd40   :  { %v2779_v16 = vmul.f32 -1.702, %v3600_v10  ;;  %v3603_v17 = vadd.f32 %v1969_v12, %v1861_v11 }
 0xd42   :  { %v1980_v19 = vmul.f32 1.442695, %v2779_v16  ;;  %v2782_v0 = vmul.f32 -1.702, %v3603_v17 }
 0xd44   :  { %v3074_v6 = vpop.eup %3073  ;;  %3075 = vpow2.f32 %v1980_v19  ;;  %v1986_v33 = vmul.f32 1.442695, %v2782_v0 }
 0xd45   :  { %v1989_v23 = vadd.f32 1.0, %v3074_v6  ;;  %v1955_v47 = vpop.f32.mrf.mxu3 }
 0xd46   :  { %3077 = vpow2.f32 %v1986_v33  ;;  %v3606_v1 = vadd.f32 %v1955_v47, %v1860_v3 }
 0xd47   :  { %3079 = vrcp.f32 %v1989_v23  ;;  %v2016_v30 = vand.u32 2147483647, %v1989_v23  ;;  %v2018_v22 = vand.u32 2147483648, %v1989_v23  ;;  %vm2012_vm9 = vweird.f32 %v1989_v23 }
 0xd48   :  { %v2781_v27 = vmul.f32 -1.702, %v3606_v1 }
 0xd49   :  { %vm2017_vm11 = vcmp.eq.f32.partialorder %v2016_v30, 8.507059e+37  ;;  %v2019_v52 = vor.u32 1.1754944e-38, %v2018_v22 }
 0xd4a   :  { %v3076_v28 = vpop.eup %3075  ;;  %v1984_v54 = vmul.f32 1.442695, %v2781_v27 }
 0xd4b   :  { %v1988_v29 = vadd.f32 1.0, %v3076_v28 }
 0xd4c   :  { %v3078_v26 = vpop.eup %3077  ;;  %3081 = vpow2.f32 %v1984_v54 }
 0xd4d   :  { %v3080_v13 = vpop.eup %3079  ;;  %3083 = vrcp.f32 %v1988_v29  ;;  %v1991_v21 = vadd.f32 1.0, %v3078_v26  ;;  %vm1997_vm15 = vweird.f32 %v1988_v29  ;;  %v2003_v55 = vand.u32 2147483648, %v1988_v29 }
 0xd4e   :  { %v2008_v34 = vmul.f32 %v3080_v13, %v1989_v23  ;;  %vm2013_vm6 = vweird.f32 %v3080_v13  ;;  %v2001_v11 = vand.u32 2147483647, %v1988_v29 }
 0xd4f   :  { %3085 = vrcp.f32 %v1991_v21  ;;  %vm3609_vm10 = vmor %vm2012_vm9, %vm2013_vm6  ;;  %v2048_v25 = vand.u32 2147483648, %v1991_v21  ;;  %v2046_v51 = vand.u32 2147483647, %v1991_v21  ;;  %vm2042_vm0 = vweird.f32 %v1991_v21 }
 0xd50   :  { %v2009_v20 = vsub.f32 1.0, %v2008_v34  ;;  %v2004_v12 = vor.u32 1.1754944e-38, %v2003_v55  ;;  %vm2002_vm14 = vcmp.eq.f32.partialorder %v2001_v11, 8.507059e+37 }
 0xd51   :  { %v2049_v59 = vor.u32 1.1754944e-38, %v2048_v25  ;;  %vm2047_vm7 = vcmp.eq.f32.partialorder %v2046_v51, 8.507059e+37 }
 0xd52   :  { %v3082_v37 = vpop.eup %3081  ;;  %v2010_v39 = vmul.f32 %v3080_v13, %v2009_v20 }
 0xd53   :  { %v3084_v38 = vpop.eup %3083  ;;  %v1990_v40 = vadd.f32 1.0, %v3082_v37 }
 0xd54   :  { %v1993_v31 = vmul.f32 %v3084_v38, %v1988_v29  ;;  %v2011_v43 = vadd.f32 %v3080_v13, %v2010_v39  ;;  %vm1998_vm13 = vweird.f32 %v3084_v38 }
 0xd55   :  { %3087 = vrcp.f32 %v1990_v40  ;;  %v3086_v41 = vpop.eup %3085  ;;  %vm3615_vm2 = vmor %vm1997_vm15, %vm1998_vm13  ;;  %v2031_v63 = vand.u32 2147483647, %v1990_v40  ;;  %v2033_v3 = vand.u32 2147483648, %v1990_v40  ;;  %vm2027_vm3 = vweird.f32 %v1990_v40 }
 0xd56   :  { %v1994_v42 = vsub.f32 1.0, %v1993_v31  ;;  %v2038_v45 = vmul.f32 %v3086_v41, %v1991_v21  ;;  %v2015_v50 = vsel %vm3609_vm10, %v3080_v13, %v2011_v43  ;;  %vm2043_vm12 = vweird.f32 %v3086_v41 }
 0xd57   :  { %v2020_v57 = vsel %vm2017_vm11, %v2019_v52, %v2015_v50  ;;  %vm2044_vm1 = vmor %vm2042_vm0, %vm2043_vm12  ;;  %v2034_v0 = vor.u32 1.1754944e-38, %v2033_v3  ;;  %vm2032_vm5 = vcmp.eq.f32.partialorder %v2031_v63, 8.507059e+37 }
 0xd58   :  { %v1995_v46 = vmul.f32 %v3084_v38, %v1994_v42  ;;  %v2039_v48 = vsub.f32 1.0, %v2038_v45  ;;  %v2053_v9 = vmul.f32 %v2020_v57, %v3597_v15  ;;  %v3004_v15 = vld [vmem:[%s3656_s13 + $0x1] ss:$0 sm:$0xff]  ;;  %v3006_v57 = vld [vmem:[%s3658_s15] ss:$0 sm:$0xff] }
 0xd5a   :  { %v2040_v32 = vmul.f32 %v3086_v41, %v2039_v48  ;;  %v1996_v53 = vadd.f32 %v3084_v38, %v1995_v46 }
 0xd5b   :  { %v3088_v44 = vpop.eup %3087 }
 0xd5c   :  { %v2023_v35 = vmul.f32 %v3088_v44, %v1990_v40  ;;  %v2041_v56 = vadd.f32 %v3086_v41, %v2040_v32  ;;  %v2000_v4 = vsel %vm3615_vm2, %v3084_v38, %v1996_v53  ;;  %vm2028_vm8 = vweird.f32 %v3088_v44 }
 0xd5d   :  { %v2005_v18 = vsel %vm2002_vm14, %v2004_v12, %v2000_v4  ;;  %vm2029_vm4 = vmor %vm2027_vm3, %vm2028_vm8 }
 0xd5e   :  { %v2024_v60 = vsub.f32 1.0, %v2023_v35  ;;  %v2045_v62 = vsel %vm2044_vm1, %v3086_v41, %v2041_v56  ;;  %v2052_v33 = vmul.f32 %v2005_v18, %v3600_v10 }
 0xd5f   :  { %v2050_v5 = vsel %vm2047_vm7, %v2049_v59, %v2045_v62 }
 0xd60   :  { %v2025_v7 = vmul.f32 %v3088_v44, %v2024_v60  ;;  %v2055_v14 = vmul.f32 %v2050_v5, %v3603_v17 }
 0xd62   :  { %v2026_v16 = vadd.f32 %v3088_v44, %v2025_v7  ;;  %v2057_v19 = vpack.c.bf16 %v2055_v14, %v2053_v9 }
 0xd64   :  { %v2030_v58 = vsel %vm2029_vm4, %v3088_v44, %v2026_v16  ;;  %2214 = vmatmul.bf16.vlgmr.msra.gmra.mxu2 %v2057_v19 }
 0xd65   :  { %v2035_v6 = vsel %vm2032_vm5, %v2034_v0, %v2030_v58 }
 0xd66   :  { %v2054_v23 = vmul.f32 %v2035_v6, %v3606_v1 }
 0xd68   :  { %v2056_v47 = vpack.c.bf16 %v2054_v23, %v2052_v33 }
 0xd6a   :  { %2200 = vmatmul.bf16.vlgmr.msrb.gmra.mxu1 %v2056_v47 }
 0xde7   :  { %v2201_v17 = vpop.f32.mrf.mxu1  ;;  %v2215_v27 = vpop.f32.mrf.mxu2 }
 0xde8   :  { %v2202_v36 = vadd.f32 %v3004_v15, %v2201_v17 }
 0xdea   :  { %v2216_v28 = vadd.f32 %v2215_v27, %v2202_v36 }
 0xdec   :  { %v2220_v54 = vadd.f32 %v2216_v28, %v3565_v24 }
 0xdee   :  { %2224 = vadd.xlane.f32.xlu1 %v2220_v54 }
 0xdef   :  { %v2203_v29 = vpop.f32.mrf.mxu1  ;;  %v2217_v13 = vpop.f32.mrf.mxu2 }
 0xdf0   :  { %v2204_v26 = vadd.f32 %v3004_v15, %v2203_v29 }
 0xdf2   :  { %v2218_v34 = vadd.f32 %v2217_v13, %v2204_v26 }
 0xdf4   :  { %v2221_v10 = vadd.f32 %v2218_v34, %v3569_v2 }
 0xdf6   :  { %2226 = vadd.xlane.f32.xlu2 %v2221_v10 }
 0xe61   :  { %v2225_v1 = vpop.xlane.xlu1 %2224 }
 0xe62   :  { %v2228_v21 = vmul.f32 %v2225_v1, %v3289_v8 }
 0xe64   :  { %v2230_v20 = vsub.f32 %v2220_v54, %v2228_v21 }
 0xe66   :  { %v2232_v37 = vmul.f32 %v2230_v20, %v2230_v20 }
 0xe68   :  { %2234 = vadd.xlane.f32.xlu2 %v2232_v37 }
 0xe69   :  { %v2227_v38 = vpop.xlane.xlu2 %2226 }
 0xe6a   :  { %v2229_v39 = vmul.f32 %v2227_v38, %v3289_v8 }
 0xe6c   :  { %v2231_v40 = vsub.f32 %v2221_v10, %v2229_v39 }
 0xe6e   :  { %v2233_v31 = vmul.f32 %v2231_v40, %v2231_v40 }
 0xe70   :  { %2236 = vadd.xlane.f32.xlu2 %v2233_v31 }
 0xedb   :  { %v2235_v24 = vpop.xlane.xlu2 %2234 }
 0xedc   :  { %v2238_v41 = vmul.f32 %v2235_v24, %v3289_v8 }
 0xede   :  { %v2240_v30 = vadd.f32 1e-05, %v2238_v41 }
 0xee0   :  { %3089 = vrsqrt.f32 %v2240_v30  ;;  %vm2248_vm9 = vweird.f32 %v2240_v30 }
 0xee3   :  { %v2237_v42 = vpop.xlane.xlu2 %2236 }
 0xee4   :  { %v2239_v2 = vmul.f32 %v2237_v42, %v3289_v8  ;;  %v3005_v8 = vld [vmem:[%s3657_s14] ss:$0 sm:$0xff] }
 0xee6   :  { %v3090_v43 = vpop.eup %3089  ;;  %v2241_v45 = vadd.f32 1e-05, %v2239_v2 }
 0xee7   :  { %v2243_v22 = vmul.f32 %v3090_v43, %v2240_v30  ;;  %vm2249_vm6 = vweird.f32 %v3090_v43 }
 0xee8   :  { %3091 = vrsqrt.f32 %v2241_v45  ;;  %vm2250_vm10 = vmor %vm2248_vm9, %vm2249_vm6  ;;  %vm2258_vm12 = vweird.f32 %v2241_v45 }
 0xee9   :  { %v2244_v46 = vmul.f32 %v3090_v43, %v2243_v22 }
 0xeeb   :  { %v2245_v48 = vmul.f32 0.5, %v2244_v46 }
 0xeed   :  { %v2246_v49 = vsub.f32 1.5, %v2245_v48 }
 0xeee   :  { %v3092_v25 = vpop.eup %3091 }
 0xeef   :  { %v2247_v44 = vmul.f32 %v3090_v43, %v2246_v49  ;;  %v2253_v50 = vmul.f32 %v3092_v25, %v2241_v45  ;;  %vm2259_vm11 = vweird.f32 %v3092_v25 }
 0xef0   :  { %vm2260_vm13 = vmor %vm2258_vm12, %vm2259_vm11 }
 0xef1   :  { %v2254_v32 = vmul.f32 %v3092_v25, %v2253_v50  ;;  %v2251_v51 = vsel %vm2250_vm10, %v3090_v43, %v2247_v44 }
 0xef2   :  { %v2262_v35 = vmul.f32 %v2251_v51, %v2230_v20 }
 0xef3   :  { %v2255_v52 = vmul.f32 0.5, %v2254_v32 }
 0xef4   :  { %v2267_v11 = vmul.f32 %v3005_v8, %v2262_v35 }
 0xef5   :  { %v2256_v53 = vsub.f32 1.5, %v2255_v52 }
 0xef6   :  { %v2272_v61 = vadd.f32 %v3006_v57, %v2267_v11 }
 0xef7   :  { %v2257_v55 = vmul.f32 %v3092_v25, %v2256_v53 }
 0xef9   :  { %v2261_v56 = vsel %vm2260_vm13, %v3092_v25, %v2257_v55 }
 0xefa   :  { %v2263_v59 = vmul.f32 %v2261_v56, %v2231_v40 }
 0xefc   :  { %v2268_v60 = vmul.f32 %v3005_v8, %v2263_v59 }
 0xefe   :  { %v2273_v62 = vadd.f32 %v3006_v57, %v2268_v60 }
 0xf00   :  { %v2979_v63 = vpack.c.bf16 %v2273_v62, %v2272_v61 }
 0xf02   :  { %2980 = vst [vmem:[%s3659_s16] sm:$0xff] %v2979_v63  }
 0xf03   :  { %2282 = vsyncpa [#allocation3], 1 }
 0xf04   :  { %2283 = vsyncpa [#allocation5], 1 }

</bundles_post_ra>
